<compile_context>
chip_gen: v5e
topology: v5e:2x2
jax: 0.10.0
libtpu: 0.0.40
codegen_flags: <defaults>
</compile_context>

<pallas_src>
import jax
import jax.numpy as jnp
import numpy as np
from jax.experimental import pallas as pl
from jax.experimental.pallas import tpu as pltpu

SQRT2_INV = 0.7071067811865476
LANE = 128


def _gelu(x):
    # exact (erf) GELU, matching torch.nn.functional.gelu default.
    return 0.5 * x * (1.0 + jax.lax.erf(x * SQRT2_INV))


def _round_up(v, m):
    return ((v + m - 1) // m) * m


# ---------------------------------------------------------------------------
# Fused per-(repeat, choice) GCN conv:
#   gathered = x[src]                       (bf16 one-hot matmul on MXU)
#   msg      = gelu(gathered + edge_emb) * (edge_weight * norm)
#   agg      = scatter_sum(msg, dst)        (pre-transposed bf16 one-hot matmul)
#   agg     += gelu(x) * deg^{-1}           (analytic self-loops)
#   out      = agg @ W_lin + b_lin
# Constant-index operands stay resident in VMEM across the grid.
# ---------------------------------------------------------------------------
def _gcn_conv_kernel(x_ref, ewn_ref, src_oh_ref, dst_oht_ref,
                     eemb_ref, dinv2_ref, wlin_ref, blin_ref, o_ref):
    x_bf = x_ref[0]                                    # (Np, Hp) bf16
    ewn = ewn_ref[0]                                   # (Ep, 1)  f32 = edge_weight * gcn_norm

    # gather x[src] on the MXU (one-hot values are exact in bf16)
    gathered = jnp.dot(src_oh_ref[...], x_bf,
                       preferred_element_type=jnp.float32)            # (Ep, Hp) f32
    msg = _gelu(gathered + eemb_ref[...]) * ewn                        # (Ep, Hp) f32

    # scatter-sum to nodes; dst one-hot is pre-transposed (Np, Ep) in the wrapper
    agg = jnp.dot(dst_oht_ref[...], msg.astype(jnp.bfloat16),
                  preferred_element_type=jnp.float32)                  # (Np, Hp) f32

    # analytic self-loops: embedding = 0, edge weight = 1, norm = dinv^2
    agg = agg + _gelu(x_bf.astype(jnp.float32)) * dinv2_ref[...]

    o_ref[0] = (jnp.dot(agg, wlin_ref[...], preferred_element_type=jnp.float32)
                + blin_ref[...])


def _build_gcn_call(SC, Np, Ep, Hp, Hop, single_buffer_consts):
    if single_buffer_consts:
        def const_spec(shape):
            return pl.BlockSpec(shape, lambda *_: (0,) * len(shape),
                                pipeline_mode=pl.Buffered(1))
    else:
        def const_spec(shape):
            return pl.BlockSpec(shape, lambda *_: (0,) * len(shape))

    in_specs = [
        pl.BlockSpec((1, Np, Hp), lambda b: (b, 0, 0)),   # x (per block, bf16)
        pl.BlockSpec((1, Ep, 1), lambda b: (b, 0, 0)),    # edge_weight * norm (per block)
        const_spec((Ep, Np)),                             # src one-hot (bf16, resident)
        const_spec((Np, Ep)),                             # dst one-hot^T (bf16, resident)
        const_spec((Ep, Hp)),                             # edge embeddings (resident)
        const_spec((Np, 1)),                              # self-loop deg^{-1} (resident)
        const_spec((Hp, Hop)),                            # lin weight (resident)
        const_spec((1, Hop)),                             # lin bias (resident)
    ]
    return pl.pallas_call(
        _gcn_conv_kernel,
        out_shape=jax.ShapeDtypeStruct((SC, Np, Hop), jnp.float32),
        grid=(SC,),
        in_specs=in_specs,
        out_specs=pl.BlockSpec((1, Np, Hop), lambda b: (b, 0, 0)),
        compiler_params=pltpu.CompilerParams(
            dimension_semantics=("parallel",),
            # 48 MiB: fits v7x's 64 MiB/TC with headroom; v5e/v6e (128 MiB
            # physical) could go toward ~100 MiB at larger graphs.
            vmem_limit_bytes=48 * 1024 * 1024,
        ),
    )


def gcn_conv_multi_edgeset(x, edge_index, edge_attr, edge_weight, params):
    """Training-branch forward of GCNConvMultiEdgeset.

    x:           (R*C*N, H)   float32
    edge_index:  (2, E)       int32
    edge_attr:   (E, Fe)      float32
    edge_weight: (R, C, E, 1) float32
    params:      (wb, bb, wlin, blin)
    returns:     (R*C*N, out_channel) float32
    """
    wb, bb, wlin, blin = params
    R, C, E, _ = edge_weight.shape
    SC = R * C
    H = x.shape[-1]
    N = x.shape[0] // SC
    Hout = wlin.shape[1]

    src = edge_index[0]
    dst = edge_index[1]

    # --- add_self_loop_multi_target + compute_gcn_norm (index glue, XLA) -----
    deg = jnp.ones((N,), jnp.float32).at[dst].add(1.0)       # +1 for the self loop
    dinv = jnp.where(deg > 0, jax.lax.rsqrt(deg), 0.0)
    norm = dinv[src] * dinv[dst]                             # (E,)  real edges only
    dinv2 = dinv * dinv                                      # self-loop norm

    # --- padded sizes: lane-dense feature dims, sublane-aligned row dims -----
    Hp = _round_up(H, LANE)
    Hop = _round_up(Hout, LANE)
    Np = _round_up(N, 16)      # 16 keeps bf16 sublane packing happy
    Ep = _round_up(E, 16)      # self loops handled analytically -> only E rows

    # --- block-invariant operands (built once in XLA, resident in VMEM) ------
    # bond encoder: tiny (E,Fe)@(Fe,H) -> plain XLA, no Fe padding, no launch.
    edge_emb = edge_attr @ wb + bb                                     # (E, H)
    eemb_p = jnp.pad(edge_emb, ((0, Ep - E), (0, Hp - H)))             # (Ep, Hp)

    src_oh = jnp.pad(jax.nn.one_hot(src, Np, dtype=jnp.bfloat16),
                     ((0, Ep - E), (0, 0)))                            # (Ep, Np)
    dst_oht = jnp.pad((jnp.arange(Np, dtype=dst.dtype)[:, None]
                       == dst[None, :]).astype(jnp.bfloat16),
                      ((0, 0), (0, Ep - E)))                           # (Np, Ep)

    dinv2_p = jnp.pad(dinv2.reshape(N, 1), ((0, Np - N), (0, 0)))      # (Np, 1)
    wlin_p = jnp.pad(wlin, ((0, Hp - H), (0, Hop - Hout)))             # (Hp, Hop)
    blin_p = jnp.pad(blin.reshape(1, -1), ((0, 0), (0, Hop - Hout)))   # (1, Hop)

    # --- per-(repeat, choice) operands ----------------------------------------
    # x cast to bf16 once here (halves its DMA); one-hots are exact, so only x
    # itself is rounded (review correctness note).
    x_blocks = jnp.pad(x.reshape(SC, N, H),
                       ((0, 0), (0, Np - N), (0, Hp - H))).astype(jnp.bfloat16)
    # fold the block-invariant GCN norm into the per-block edge weight (once, XLA)
    ewn = jnp.pad(edge_weight.reshape(SC, E, 1) * norm[None, :, None],
                  ((0, 0), (0, Ep - E), (0, 0)))                       # (SC, Ep, 1)

    operands = (x_blocks, ewn, src_oh, dst_oht, eemb_p, dinv2_p, wlin_p, blin_p)
    try:
        out_blocks = _build_gcn_call(SC, Np, Ep, Hp, Hop, True)(*operands)
    except Exception:
        # pipeline_mode=pl.Buffered(1) not supported by this jax/Mosaic build;
        # fall back to the default double-buffered resident operands.
        out_blocks = _build_gcn_call(SC, Np, Ep, Hp, Hop, False)(*operands)

    return out_blocks[:, :N, :Hout].reshape(SC * N, Hout)


# ---------------------------------------------------------------------------
# Pure-JAX reference (same math, f32 everywhere, no padding) for a sanity check
# ---------------------------------------------------------------------------
def reference_forward(x, edge_index, edge_attr, edge_weight, params):
    wb, bb, wlin, blin = params
    R, C, E, _ = edge_weight.shape
    SC = R * C
    H = x.shape[-1]
    N = x.shape[0] // SC

    edge_emb = edge_attr @ wb + bb                                  # (E, H)
    ar = jnp.arange(N, dtype=edge_index.dtype)
    src = jnp.concatenate([edge_index[0], ar])
    dst = jnp.concatenate([edge_index[1], ar])
    edge_emb = jnp.concatenate([edge_emb, jnp.zeros((N, H), jnp.float32)], 0)
    ew = jnp.concatenate([edge_weight, jnp.ones((R, C, N, 1), jnp.float32)], 2)

    deg = jnp.zeros((N,), jnp.float32).at[dst].add(1.0)
    dinv = jnp.where(deg > 0, 1.0 / jnp.sqrt(deg), 0.0)
    norm = dinv[src] * dinv[dst]

    ux = x.reshape(R, C, N, H)
    msg = _gelu(ux[:, :, src, :] + edge_emb[None, None]) * norm[None, None, :, None]
    msg = msg * ew
    out = jnp.zeros((R, C, N, H), jnp.float32).at[:, :, dst, :].add(msg)
    out = out.reshape(x.shape)
    return out @ wlin + blin


if __name__ == "__main__":
    # small, module-consistent shapes
    R, C = 2, 2                  # repeats (samples), choices (centroids)
    N, E = 16, 32                # nodes per graph-block, edges
    H, Fe, Hout = 32, 6, 64      # in_channel, edge features, out_channel

    keys = iter(jax.random.split(jax.random.PRNGKey(0), 16))

    def rnd(shape, scale=0.1):
        return (scale * jax.random.normal(next(keys), shape)).astype(jnp.float32)

    x = rnd((R * C * N, H), 1.0)
    edge_index = jax.random.randint(next(keys), (2, E), 0, N, dtype=jnp.int32)
    edge_attr = rnd((E, Fe), 1.0)
    edge_weight = jax.random.uniform(next(keys), (R, C, E, 1), dtype=jnp.float32)

    params = (
        rnd((Fe, H)), rnd((1, H)),          # bond encoder linear
        rnd((H, Hout)), rnd((1, Hout)),     # self.lin
    )

    out = gcn_conv_multi_edgeset(x, edge_index, edge_attr, edge_weight, params)
    out = jax.block_until_ready(out)
    assert out.shape == (R * C * N, Hout)

    ref = reference_forward(x, edge_index, edge_attr, edge_weight, params)
    # bf16 MXU gather/scatter path (review item 2): one-hot values are exact,
    # only x / the message tensor are bf16-rounded -> tolerance 5e-3.
    np.testing.assert_allclose(np.asarray(out), np.asarray(ref), rtol=5e-3, atol=5e-3)

    print("KERNEL_OK")
</pallas_src>

<mosaic_0001>
module attributes {stable_mosaic.version = 11 : i64} {
  func.func @_gcn_conv_kernel(%arg0: i32, %arg1: memref<1x16x128xbf16, #tpu.memory_space<vmem>>, %arg2: memref<1x32x1xf32, #tpu.memory_space<vmem>>, %arg3: memref<32x16xbf16, #tpu.memory_space<vmem>>, %arg4: memref<16x32xbf16, #tpu.memory_space<vmem>>, %arg5: memref<32x128xf32, #tpu.memory_space<vmem>>, %arg6: memref<16x1xf32, #tpu.memory_space<vmem>>, %arg7: memref<128x128xf32, #tpu.memory_space<vmem>>, %arg8: memref<1x128xf32, #tpu.memory_space<vmem>>, %arg9: memref<1x16x128xf32, #tpu.memory_space<vmem>>) attributes {dimension_semantics = [#tpu.dimension_semantics<parallel>], iteration_bounds = array<i64: 4>, scalar_prefetch = 0 : i64, scratch_operands = 0 : i64, tpu.core_type = #tpu.core_type<tc>, window_params = [{transform_indices = @transform_0, window_bounds = array<i64: 1, 16, 128>}, {transform_indices = @transform_1, window_bounds = array<i64: 1, 32, 1>}, {pipeline_mode = #tpu.pipeline_mode<synchronous>, transform_indices = @transform_2, window_bounds = array<i64: 32, 16>}, {pipeline_mode = #tpu.pipeline_mode<synchronous>, transform_indices = @transform_3, window_bounds = array<i64: 16, 32>}, {pipeline_mode = #tpu.pipeline_mode<synchronous>, transform_indices = @transform_4, window_bounds = array<i64: 32, 128>}, {pipeline_mode = #tpu.pipeline_mode<synchronous>, transform_indices = @transform_5, window_bounds = array<i64: 16, 1>}, {pipeline_mode = #tpu.pipeline_mode<synchronous>, transform_indices = @transform_6, window_bounds = array<i64: 128, 128>}, {pipeline_mode = #tpu.pipeline_mode<synchronous>, transform_indices = @transform_7, window_bounds = array<i64: 1, 128>}, {transform_indices = @transform_8, window_bounds = array<i64: 1, 16, 128>}]} {
    %c0 = arith.constant 0 : index
    %c0_0 = arith.constant 0 : index
    %c0_1 = arith.constant 0 : index
    %0 = vector.load %arg1[%c0, %c0_0, %c0_1] : memref<1x16x128xbf16, #tpu.memory_space<vmem>>, vector<1x16x128xbf16>
    %1 = vector.shape_cast %0 : vector<1x16x128xbf16> to vector<16x128xbf16>
    %c0_2 = arith.constant 0 : index
    %c0_3 = arith.constant 0 : index
    %c0_4 = arith.constant 0 : index
    %2 = vector.load %arg2[%c0_2, %c0_3, %c0_4] : memref<1x32x1xf32, #tpu.memory_space<vmem>>, vector<1x32x1xf32>
    %3 = vector.shape_cast %2 : vector<1x32x1xf32> to vector<32x1xf32>
    %c0_5 = arith.constant 0 : index
    %c0_6 = arith.constant 0 : index
    %4 = vector.load %arg3[%c0_5, %c0_6] : memref<32x16xbf16, #tpu.memory_space<vmem>>, vector<32x16xbf16>
    %cst = arith.constant dense<0.000000e+00> : vector<32x128xf32>
    %5 = tpu.matmul %4, %1, %cst {dimension_numbers = #tpu.dot_dimension_numbers<[1], [0], [0], [1], [0, 0, 1, 1], [], []>} : vector<32x16xbf16>, vector<16x128xbf16>, vector<32x128xf32> -> vector<32x128xf32>
    %c0_7 = arith.constant 0 : index
    %c0_8 = arith.constant 0 : index
    %6 = vector.load %arg5[%c0_7, %c0_8] : memref<32x128xf32, #tpu.memory_space<vmem>>, vector<32x128xf32>
    %7 = arith.addf %5, %6 : vector<32x128xf32>
    %cst_9 = arith.constant 5.000000e-01 : f32
    %8 = vector.broadcast %cst_9 : f32 to vector<32x128xf32>
    %9 = arith.mulf %8, %7 : vector<32x128xf32>
    %cst_10 = arith.constant 0.707106769 : f32
    %10 = vector.broadcast %cst_10 : f32 to vector<32x128xf32>
    %11 = arith.mulf %7, %10 : vector<32x128xf32>
    %12 = math.erf %11 : vector<32x128xf32>
    %cst_11 = arith.constant 1.000000e+00 : f32
    %13 = vector.broadcast %cst_11 : f32 to vector<32x128xf32>
    %14 = arith.addf %13, %12 : vector<32x128xf32>
    %15 = arith.mulf %9, %14 : vector<32x128xf32>
    %16 = vector.broadcast %3 : vector<32x1xf32> to vector<32x128xf32>
    %17 = arith.mulf %15, %16 : vector<32x128xf32>
    %c0_12 = arith.constant 0 : index
    %c0_13 = arith.constant 0 : index
    %18 = vector.load %arg4[%c0_12, %c0_13] : memref<16x32xbf16, #tpu.memory_space<vmem>>, vector<16x32xbf16>
    %19 = arith.truncf %17 : vector<32x128xf32> to vector<32x128xbf16>
    %cst_14 = arith.constant dense<0.000000e+00> : vector<16x128xf32>
    %20 = tpu.matmul %18, %19, %cst_14 {dimension_numbers = #tpu.dot_dimension_numbers<[1], [0], [0], [1], [0, 0, 1, 1], [], []>} : vector<16x32xbf16>, vector<32x128xbf16>, vector<16x128xf32> -> vector<16x128xf32>
    %21 = arith.extf %1 : vector<16x128xbf16> to vector<16x128xf32>
    %cst_15 = arith.constant 5.000000e-01 : f32
    %22 = vector.broadcast %cst_15 : f32 to vector<16x128xf32>
    %23 = arith.mulf %22, %21 : vector<16x128xf32>
    %cst_16 = arith.constant 0.707106769 : f32
    %24 = vector.broadcast %cst_16 : f32 to vector<16x128xf32>
    %25 = arith.mulf %21, %24 : vector<16x128xf32>
    %26 = math.erf %25 : vector<16x128xf32>
    %cst_17 = arith.constant 1.000000e+00 : f32
    %27 = vector.broadcast %cst_17 : f32 to vector<16x128xf32>
    %28 = arith.addf %27, %26 : vector<16x128xf32>
    %29 = arith.mulf %23, %28 : vector<16x128xf32>
    %c0_18 = arith.constant 0 : index
    %c0_19 = arith.constant 0 : index
    %30 = vector.load %arg6[%c0_18, %c0_19] : memref<16x1xf32, #tpu.memory_space<vmem>>, vector<16x1xf32>
    %31 = vector.broadcast %30 : vector<16x1xf32> to vector<16x128xf32>
    %32 = arith.mulf %29, %31 : vector<16x128xf32>
    %33 = arith.addf %20, %32 : vector<16x128xf32>
    %c0_20 = arith.constant 0 : index
    %c0_21 = arith.constant 0 : index
    %34 = vector.load %arg7[%c0_20, %c0_21] : memref<128x128xf32, #tpu.memory_space<vmem>>, vector<128x128xf32>
    %cst_22 = arith.constant dense<0.000000e+00> : vector<16x128xf32>
    %35 = tpu.matmul %33, %34, %cst_22 {dimension_numbers = #tpu.dot_dimension_numbers<[1], [0], [0], [1], [0, 0, 1, 1], [], []>} : vector<16x128xf32>, vector<128x128xf32>, vector<16x128xf32> -> vector<16x128xf32>
    %c0_23 = arith.constant 0 : index
    %c0_24 = arith.constant 0 : index
    %36 = vector.load %arg8[%c0_23, %c0_24] : memref<1x128xf32, #tpu.memory_space<vmem>>, vector<1x128xf32>
    %37 = vector.broadcast %36 : vector<1x128xf32> to vector<16x128xf32>
    %38 = arith.addf %35, %37 : vector<16x128xf32>
    %c0_25 = arith.constant 0 : index
    %c0_26 = arith.constant 0 : index
    %c0_27 = arith.constant 0 : index
    %39 = vector.load %arg9[%c0_25, %c0_26, %c0_27] : memref<1x16x128xf32, #tpu.memory_space<vmem>>, vector<1x16x128xf32>
    %40 = vector.shape_cast %39 : vector<1x16x128xf32> to vector<16x128xf32>
    %41 = vector.shape_cast %38 : vector<16x128xf32> to vector<1x16x128xf32>
    tpu.vector_store %arg9[%c0_25, %c0_26, %c0_27], %41 {strides = array<i32>} : memref<1x16x128xf32, #tpu.memory_space<vmem>>, vector<1x16x128xf32>,
    return
  }
  func.func @transform_0(%arg0: i32) -> (i32, i32, i32) {
    %c0_i32 = arith.constant 0 : i32
    %c0_i32_0 = arith.constant 0 : i32
    %c0_i32_1 = arith.constant 0 : i32
    return %arg0, %c0_i32, %c0_i32_0 : i32, i32, i32
  }
  func.func @transform_1(%arg0: i32) -> (i32, i32, i32) {
    %c0_i32 = arith.constant 0 : i32
    %c0_i32_0 = arith.constant 0 : i32
    %c0_i32_1 = arith.constant 0 : i32
    return %arg0, %c0_i32, %c0_i32_0 : i32, i32, i32
  }
  func.func @transform_2(%arg0: i32) -> (i32, i32) {
    %c0_i32 = arith.constant 0 : i32
    %c0_i32_0 = arith.constant 0 : i32
    %c0_i32_1 = arith.constant 0 : i32
    return %c0_i32, %c0_i32_0 : i32, i32
  }
  func.func @transform_3(%arg0: i32) -> (i32, i32) {
    %c0_i32 = arith.constant 0 : i32
    %c0_i32_0 = arith.constant 0 : i32
    %c0_i32_1 = arith.constant 0 : i32
    return %c0_i32, %c0_i32_0 : i32, i32
  }
  func.func @transform_4(%arg0: i32) -> (i32, i32) {
    %c0_i32 = arith.constant 0 : i32
    %c0_i32_0 = arith.constant 0 : i32
    %c0_i32_1 = arith.constant 0 : i32
    return %c0_i32, %c0_i32_0 : i32, i32
  }
  func.func @transform_5(%arg0: i32) -> (i32, i32) {
    %c0_i32 = arith.constant 0 : i32
    %c0_i32_0 = arith.constant 0 : i32
    %c0_i32_1 = arith.constant 0 : i32
    return %c0_i32, %c0_i32_0 : i32, i32
  }
  func.func @transform_6(%arg0: i32) -> (i32, i32) {
    %c0_i32 = arith.constant 0 : i32
    %c0_i32_0 = arith.constant 0 : i32
    %c0_i32_1 = arith.constant 0 : i32
    return %c0_i32, %c0_i32_0 : i32, i32
  }
  func.func @transform_7(%arg0: i32) -> (i32, i32) {
    %c0_i32 = arith.constant 0 : i32
    %c0_i32_0 = arith.constant 0 : i32
    %c0_i32_1 = arith.constant 0 : i32
    return %c0_i32, %c0_i32_0 : i32, i32
  }
  func.func @transform_8(%arg0: i32) -> (i32, i32, i32) {
    %c0_i32 = arith.constant 0 : i32
    %c0_i32_0 = arith.constant 0 : i32
    %c0_i32_1 = arith.constant 0 : i32
    return %arg0, %c0_i32, %c0_i32_0 : i32, i32, i32
  }
}

module attributes {stable_mosaic.version = 11 : i64} {
  func.func @_gcn_conv_kernel(%arg0: i32, %arg1: memref<1x16x128xbf16, #tpu.memory_space<vmem>>, %arg2: memref<1x32x1xf32, #tpu.memory_space<vmem>>, %arg3: memref<32x16xbf16, #tpu.memory_space<vmem>>, %arg4: memref<16x32xbf16, #tpu.memory_space<vmem>>, %arg5: memref<32x128xf32, #tpu.memory_space<vmem>>, %arg6: memref<16x1xf32, #tpu.memory_space<vmem>>, %arg7: memref<128x128xf32, #tpu.memory_space<vmem>>, %arg8: memref<1x128xf32, #tpu.memory_space<vmem>>, %arg9: memref<1x16x128xf32, #tpu.memory_space<vmem>>) attributes {dimension_semantics = [#tpu.dimension_semantics<parallel>], iteration_bounds = array<i64: 4>, scalar_prefetch = 0 : i64, scratch_operands = 0 : i64, tpu.core_type = #tpu.core_type<tc>, window_params = [{transform_indices = @transform_0, window_bounds = array<i64: 1, 16, 128>}, {transform_indices = @transform_1, window_bounds = array<i64: 1, 32, 1>}, {pipeline_mode = #tpu.pipeline_mode<synchronous>, transform_indices = @transform_2, window_bounds = array<i64: 32, 16>}, {pipeline_mode = #tpu.pipeline_mode<synchronous>, transform_indices = @transform_3, window_bounds = array<i64: 16, 32>}, {pipeline_mode = #tpu.pipeline_mode<synchronous>, transform_indices = @transform_4, window_bounds = array<i64: 32, 128>}, {pipeline_mode = #tpu.pipeline_mode<synchronous>, transform_indices = @transform_5, window_bounds = array<i64: 16, 1>}, {pipeline_mode = #tpu.pipeline_mode<synchronous>, transform_indices = @transform_6, window_bounds = array<i64: 128, 128>}, {pipeline_mode = #tpu.pipeline_mode<synchronous>, transform_indices = @transform_7, window_bounds = array<i64: 1, 128>}, {transform_indices = @transform_8, window_bounds = array<i64: 1, 16, 128>}]} {
    %c0 = arith.constant 0 : index
    %c0_0 = arith.constant 0 : index
    %c0_1 = arith.constant 0 : index
    %0 = vector.load %arg1[%c0, %c0_0, %c0_1] : memref<1x16x128xbf16, #tpu.memory_space<vmem>>, vector<1x16x128xbf16>
    %1 = vector.shape_cast %0 : vector<1x16x128xbf16> to vector<16x128xbf16>
    %c0_2 = arith.constant 0 : index
    %c0_3 = arith.constant 0 : index
    %c0_4 = arith.constant 0 : index
    %2 = vector.load %arg2[%c0_2, %c0_3, %c0_4] : memref<1x32x1xf32, #tpu.memory_space<vmem>>, vector<1x32x1xf32>
    %3 = vector.shape_cast %2 : vector<1x32x1xf32> to vector<32x1xf32>
    %c0_5 = arith.constant 0 : index
    %c0_6 = arith.constant 0 : index
    %4 = vector.load %arg3[%c0_5, %c0_6] : memref<32x16xbf16, #tpu.memory_space<vmem>>, vector<32x16xbf16>
    %cst = arith.constant dense<0.000000e+00> : vector<32x128xf32>
    %5 = tpu.matmul %4, %1, %cst {dimension_numbers = #tpu.dot_dimension_numbers<[1], [0], [0], [1], [0, 0, 1, 1], [], []>} : vector<32x16xbf16>, vector<16x128xbf16>, vector<32x128xf32> -> vector<32x128xf32>
    %c0_7 = arith.constant 0 : index
    %c0_8 = arith.constant 0 : index
    %6 = vector.load %arg5[%c0_7, %c0_8] : memref<32x128xf32, #tpu.memory_space<vmem>>, vector<32x128xf32>
    %7 = arith.addf %5, %6 : vector<32x128xf32>
    %cst_9 = arith.constant 5.000000e-01 : f32
    %8 = vector.broadcast %cst_9 : f32 to vector<32x128xf32>
    %9 = arith.mulf %8, %7 : vector<32x128xf32>
    %cst_10 = arith.constant 0.707106769 : f32
    %10 = vector.broadcast %cst_10 : f32 to vector<32x128xf32>
    %11 = arith.mulf %7, %10 : vector<32x128xf32>
    %12 = math.erf %11 : vector<32x128xf32>
    %cst_11 = arith.constant 1.000000e+00 : f32
    %13 = vector.broadcast %cst_11 : f32 to vector<32x128xf32>
    %14 = arith.addf %13, %12 : vector<32x128xf32>
    %15 = arith.mulf %9, %14 : vector<32x128xf32>
    %16 = vector.broadcast %3 : vector<32x1xf32> to vector<32x128xf32>
    %17 = arith.mulf %15, %16 : vector<32x128xf32>
    %c0_12 = arith.constant 0 : index
    %c0_13 = arith.constant 0 : index
    %18 = vector.load %arg4[%c0_12, %c0_13] : memref<16x32xbf16, #tpu.memory_space<vmem>>, vector<16x32xbf16>
    %19 = arith.truncf %17 : vector<32x128xf32> to vector<32x128xbf16>
    %cst_14 = arith.constant dense<0.000000e+00> : vector<16x128xf32>
    %20 = tpu.matmul %18, %19, %cst_14 {dimension_numbers = #tpu.dot_dimension_numbers<[1], [0], [0], [1], [0, 0, 1, 1], [], []>} : vector<16x32xbf16>, vector<32x128xbf16>, vector<16x128xf32> -> vector<16x128xf32>
    %21 = arith.extf %1 : vector<16x128xbf16> to vector<16x128xf32>
    %cst_15 = arith.constant 5.000000e-01 : f32
    %22 = vector.broadcast %cst_15 : f32 to vector<16x128xf32>
    %23 = arith.mulf %22, %21 : vector<16x128xf32>
    %cst_16 = arith.constant 0.707106769 : f32
    %24 = vector.broadcast %cst_16 : f32 to vector<16x128xf32>
    %25 = arith.mulf %21, %24 : vector<16x128xf32>
    %26 = math.erf %25 : vector<16x128xf32>
    %cst_17 = arith.constant 1.000000e+00 : f32
    %27 = vector.broadcast %cst_17 : f32 to vector<16x128xf32>
    %28 = arith.addf %27, %26 : vector<16x128xf32>
    %29 = arith.mulf %23, %28 : vector<16x128xf32>
    %c0_18 = arith.constant 0 : index
    %c0_19 = arith.constant 0 : index
    %30 = vector.load %arg6[%c0_18, %c0_19] : memref<16x1xf32, #tpu.memory_space<vmem>>, vector<16x1xf32>
    %31 = vector.broadcast %30 : vector<16x1xf32> to vector<16x128xf32>
    %32 = arith.mulf %29, %31 : vector<16x128xf32>
    %33 = arith.addf %20, %32 : vector<16x128xf32>
    %c0_20 = arith.constant 0 : index
    %c0_21 = arith.constant 0 : index
    %34 = vector.load %arg7[%c0_20, %c0_21] : memref<128x128xf32, #tpu.memory_space<vmem>>, vector<128x128xf32>
    %cst_22 = arith.constant dense<0.000000e+00> : vector<16x128xf32>
    %35 = tpu.matmul %33, %34, %cst_22 {dimension_numbers = #tpu.dot_dimension_numbers<[1], [0], [0], [1], [0, 0, 1, 1], [], []>} : vector<16x128xf32>, vector<128x128xf32>, vector<16x128xf32> -> vector<16x128xf32>
    %c0_23 = arith.constant 0 : index
    %c0_24 = arith.constant 0 : index
    %36 = vector.load %arg8[%c0_23, %c0_24] : memref<1x128xf32, #tpu.memory_space<vmem>>, vector<1x128xf32>
    %37 = vector.broadcast %36 : vector<1x128xf32> to vector<16x128xf32>
    %38 = arith.addf %35, %37 : vector<16x128xf32>
    %c0_25 = arith.constant 0 : index
    %c0_26 = arith.constant 0 : index
    %c0_27 = arith.constant 0 : index
    %39 = vector.load %arg9[%c0_25, %c0_26, %c0_27] : memref<1x16x128xf32, #tpu.memory_space<vmem>>, vector<1x16x128xf32>
    %40 = vector.shape_cast %39 : vector<1x16x128xf32> to vector<16x128xf32>
    %41 = vector.shape_cast %38 : vector<16x128xf32> to vector<1x16x128xf32>
    tpu.vector_store %arg9[%c0_25, %c0_26, %c0_27], %41 {strides = array<i32>} : memref<1x16x128xf32, #tpu.memory_space<vmem>>, vector<1x16x128xf32>,
    return
  }
  func.func @transform_0(%arg0: i32) -> (i32, i32, i32) {
    %c0_i32 = arith.constant 0 : i32
    %c0_i32_0 = arith.constant 0 : i32
    %c0_i32_1 = arith.constant 0 : i32
    return %arg0, %c0_i32, %c0_i32_0 : i32, i32, i32
  }
  func.func @transform_1(%arg0: i32) -> (i32, i32, i32) {
    %c0_i32 = arith.constant 0 : i32
    %c0_i32_0 = arith.constant 0 : i32
    %c0_i32_1 = arith.constant 0 : i32
    return %arg0, %c0_i32, %c0_i32_0 : i32, i32, i32
  }
  func.func @transform_2(%arg0: i32) -> (i32, i32) {
    %c0_i32 = arith.constant 0 : i32
    %c0_i32_0 = arith.constant 0 : i32
    %c0_i32_1 = arith.constant 0 : i32
    return %c0_i32, %c0_i32_0 : i32, i32
  }
  func.func @transform_3(%arg0: i32) -> (i32, i32) {
    %c0_i32 = arith.constant 0 : i32
    %c0_i32_0 = arith.constant 0 : i32
    %c0_i32_1 = arith.constant 0 : i32
    return %c0_i32, %c0_i32_0 : i32, i32
  }
  func.func @transform_4(%arg0: i32) -> (i32, i32) {
    %c0_i32 = arith.constant 0 : i32
    %c0_i32_0 = arith.constant 0 : i32
    %c0_i32_1 = arith.constant 0 : i32
    return %c0_i32, %c0_i32_0 : i32, i32
  }
  func.func @transform_5(%arg0: i32) -> (i32, i32) {
    %c0_i32 = arith.constant 0 : i32
    %c0_i32_0 = arith.constant 0 : i32
    %c0_i32_1 = arith.constant 0 : i32
    return %c0_i32, %c0_i32_0 : i32, i32
  }
  func.func @transform_6(%arg0: i32) -> (i32, i32) {
    %c0_i32 = arith.constant 0 : i32
    %c0_i32_0 = arith.constant 0 : i32
    %c0_i32_1 = arith.constant 0 : i32
    return %c0_i32, %c0_i32_0 : i32, i32
  }
  func.func @transform_7(%arg0: i32) -> (i32, i32) {
    %c0_i32 = arith.constant 0 : i32
    %c0_i32_0 = arith.constant 0 : i32
    %c0_i32_1 = arith.constant 0 : i32
    return %c0_i32, %c0_i32_0 : i32, i32
  }
  func.func @transform_8(%arg0: i32) -> (i32, i32, i32) {
    %c0_i32 = arith.constant 0 : i32
    %c0_i32_0 = arith.constant 0 : i32
    %c0_i32_1 = arith.constant 0 : i32
    return %arg0, %c0_i32, %c0_i32_0 : i32, i32, i32
  }
}

</mosaic_0001>

<bundles_post_ra>
// kernel: tpu_custom_call.1
= control target key start
LH: loop header
LB: loop body
LE: loop exit
PB: predicated region body
PF: predicated region fallthrough
CT: control target
= control target key end

     0   :  { %13 = vsyncpa [#allocation3], 0  ;;  %s1504_s0 = inlined_call_operand.vmem [shape: bf16[4,16,128], index: 0, kind: input, shape index: {}]   ;;  %s1505_s1 = inlined_call_operand.vmem [shape: f32[4,32,1], index: 1, kind: input, shape index: {}]   ;;  %s1506_s2 = inlined_call_operand.vmem [shape: bf16[32,16], index: 2, kind: input, shape index: {}]   ;;  %s1507_s3 = inlined_call_operand.vmem [shape: bf16[16,32], index: 3, kind: input, shape index: {}]   ;;  %s1508_s4 = inlined_call_operand.hbm [shape: f32[32,128], index: 4, kind: input, shape index: {}]   ;;  %s1509_s5 = inlined_call_operand.vmem [shape: f32[16,1], index: 5, kind: input, shape index: {}]   ;;  %s1510_s6 = inlined_call_operand.vmem [shape: f32[128,128], index: 6, kind: input, shape index: {}]   ;;  %s1511_s7 = inlined_call_operand.vmem [shape: f32[1,128], index: 7, kind: input, shape index: {}]   ;;  %s1512_s8 = inlined_call_operand.hbm [shape: f32[4,16,128], index: 8, kind: output, shape index: {}]  }
   0x1   :  { %14 = vsyncpa [#allocation4], 0 }
   0x2   :  { %16 = vsyncpa [#allocation4 + $0x1], 0  ;;  %s1160_s27 = smov 0   ;;  %s1162_s28 = smov 0  }
   0x3   :  { %s1164_s29 = smov 0   ;;  %s1166_s30 = smov 0  }
   0x4 LB: > { %s1181_s9 = sadd.s32 4294967295, %s1107_s30   ;;  %s876_s10 = sadd.s32 4294967294, %s1107_s30   ;;  %s1107_s30 = sphi %s1166_s30, %s1524_s30   ;;  %s1103_s29 = sphi %s1164_s29, %s1523_s29   ;;  %s1099_s28 = sphi %s1162_s28, %s1522_s28   ;;  %s1095_s27 = sphi %s1160_s27, %s1521_s27  }
   0x5   : > { %s1185_s11 = sadd.s32 1, %s1107_s30   ;;  %s207_s12 = sadd.s32 1, %s1103_s29 }
   0x6   : > { %s204_s13 = ssub.s32 %s1107_s30, %s1185_s11  ;;  %p217_p0 = scmp.ne.s32.totalorder %s1103_s29, %s1099_s28 }
   0x7   : > { %p205_p1 = scmp.eq.s32.totalorder %s204_s13, 0  ;;  %p218_p2 = scmp.eq.s32.totalorder %s1181_s9, 3 }
   0x8   : > { %p223_p3 = scmp.ne.s32.totalorder %s1099_s28, %s1095_s27  ;;  %p224_p4 = scmp.eq.s32.totalorder %s876_s10, 3 }
   0x9   : > { %s1196_s14 = scalar_select %p205_p1, %s1103_s29, %s207_s12  }
   0xa   : > { %p1198_p5 = por %p218_p2, %p217_p0  ;;  %p1202_p6 = por %p224_p4, %p223_p3 }
   0xb   : > { %p877_p7 = scmp.ge.s32.totalorder %s1107_s30, 1  ;;  %p231_p8 = scmp.lt.s32.totalorder %s1107_s30, 5 }
   0xc   : > { %p954_p9 = scmp.eq.s32.totalorder %s1181_s9, 0  ;;  %s248_s19 = sshll.u32 %s1508_s4, 4  ;;  %s249_s19 = int_to_ptr.hbm [resolvable:$true] %s248_s19 }
   0xd   : > { %p232_p10 = pnand %p877_p7, %p231_p8  ;;  %s1109_s20 = smov [#allocation2]  }
   0xe   : > { %s250_s21 = sshll.u32 %s1109_s20, 4  ;;  %s1110_s22 = smov 128   ;;  %s251_s21 = int_to_ptr.vmem [resolvable:$true] %s250_s21 }
   0xf   : > { %p946_p11 = pneg %p232_p10  ;;  %s1111_s23 = smov 8  }
  0x10   : > { %291 = sbr.rel (%p232_p10) target bundleno = 520 (0x208), region = 52 }
  0x11   : > { %p947_p12 = pnand %p954_p9, %p946_p11 }
  0x13   : > { %949 = dma.hbm_to_vmem [thread:$0]  (!%p947_p12), %s249_s19, 512, %s251_s21, [#allocation3], %s1110_s22, %s1110_s22, %s1111_s23  }
  0x15   : > { %1086 = dma.done.wait (%p954_p9), [#allocation3], 512  }
  0x16   : > { %1088 = vsyncadd (%p954_p9), [#allocation3], 4294966784  ;;  %p331_p13 = scmp.lt.s32.totalorder %s1181_s9, 3  ;;  %v1112_v0 = vmov 0   ;;  %v920_v2 = vld [vmem:[%s1506_s2] sm:$0xff]  ;;  %vm372_vm0 = vcmask 130048  }
  0x17   : > { %996 = vset.pattern.permute.xlu1 %v1112_v0  ;;  %995 = vset.pattern.permute.xlu0 %v1112_v0  ;;  %v921_v7 = vld [vmem:[%s1506_s2 + $0x8] sm:$0xff]  ;;  %v352_v8 = vld [vmem:[#allocation2] sm:$0xff]  ;;  %v354_v21 = vld [vmem:[#allocation2 + $0x10] sm:$0xff]  ;;  %s923_s12 = sshll.u32 %s1181_s9, 4  ;;  %s1061_s10 = scalar_lea.hbm %s1512_s8, 64 }
  0x18   : > { %s332_s24 = scalar_select %p331_p13, %s1181_s9, 3  ;;  %997 = vset.pattern.permute.xlu2 %v1112_v0  ;;  %v353_v13 = vld [vmem:[#allocation2 + $0x8] sm:$0xff]  ;;  %v355_v33 = vld [vmem:[#allocation2 + $0x18] sm:$0xff] }
  0x19   : > { %s786_s20 = scalar_lea.hbm %s1512_s8, %s923_s12 }
  0x1a   : > { %s917_s25 = sshll.u32 %s332_s24, 3  ;;  %s918_s26 = sshll.u32 %s332_s24, 5 }
  0x1b   : > { %s1223_s13 = scalar_lea.vmem %s1504_s0, %s917_s25  ;;  %s340_s19 = scalar_lea.vmem %s1505_s1, %s918_s26 }
  0x1c   : > { %v919_v1 = vld [vmem:[%s1223_s13] sm:$0xff]  ;;  %v346_v4 = vld [vmem:[%s340_s19 + $0x10] sm:$0xff]  ;;  %v345_v5 = vld [vmem:[%s340_s19 + $0x8] sm:$0xff]  ;;  %s328_s25 = sand.u32 1, %s1099_s28   ;;  %s789_s22 = sshll.u32 %s786_s20, 4  ;;  %s790_s22 = int_to_ptr.hbm [resolvable:$true] %s789_s22 }
  0x1d   : > { %v344_v3 = vld [vmem:[%s340_s19] sm:$0xff]  ;;  %386 = vmatpush.bf16.msra.mxu0 %v919_v1  ;;  %586 = vperm.xlu0 %995, %v346_v4   ;;  %v347_v6 = vld [vmem:[%s340_s19 + $0x18] sm:$0xff]  ;;  %s775_s23 = scalar_lea.sflag [#allocation4], %s328_s25  ;;  %s1055_s24 = sshra.s32 %s790_s22, 4  ;;  %s1056_s24 = int_to_ptr.hbm [resolvable:$true] %s1055_s24 }
  0x1e   : > { %576 = vperm.xlu1 %996, %v344_v3   ;;  %s1057_s26 = scalar_lea.hbm %s1056_s24, 16  ;;  %p1062_p3 = scmp.lt.s32.totalorder %s1056_s24, %s1512_s8 }
  0x1f   : > { %p1058_p0 = scmp.ne.s32.totalorder %s1056_s24, %s1057_s26  ;;  %p1063_p4 = scmp.lt.s32.totalorder %s1061_s10, %s1057_s26 }
  0x20   : > { %899 = vmatmul.msk.bf16.vlgmr.msra.gmra.mxu0 %vm372_vm0, %v920_v2 }
  0x21   : > { %p1059_p1 = pnand %p1058_p0, %p1198_p5  ;;  %p1064_p7 = por %p1063_p4, %p1062_p3 }
  0x23   : > { %p1060_p2 = pneg %p1059_p1 }
  0x25   : > { %591 = vperm.xlu0 %995, %v347_v6   ;;  %p1065_p8 = pnand %p1064_p7, %p1060_p2 }
  0x26   : > { %581 = vperm.xlu1 %996, %v345_v5  }
  0x30   : > { %900 = vmatmul.msk.bf16.gmra.mxu0 %vm372_vm0, %v921_v7 }
  0x9d   : > { %v388_v9 = vpop.f32.mrf.mxu0 }
  0x9e   : > { %v1235_v10 = vadd.f32 %v388_v9, %v352_v8 }
  0xa0   : > { %v1238_v11 = vmul.f32 0.70710677, %v1235_v10 }
  0xa2   : > { %v406_v12 = vmul.f32 %v1238_v11, %v1238_v11 }
  0xa4   : > { %v1242_v14 = vmin.f32 %v406_v12, 16.0 }
  0xa5   : > { %v390_v15 = vpop.f32.mrf.mxu0 }
  0xa6   : > { %v1244_v16 = vadd.f32 %v390_v15, %v353_v13  ;;  %v419_v17 = vmul.f32 3.8918573e-05, %v1242_v14  ;;  %v408_v35 = vmul.f32 2.1237322e-06, %v1242_v14 }
  0xa8   : > { %v1248_v18 = vmul.f32 0.70710677, %v1244_v16  ;;  %v420_v19 = vadd.f32 0.001143296, %v419_v17  ;;  %v409_v45 = vadd.f32 0.00028619796, %v408_v35 }
  0xaa   : > { %v446_v20 = vmul.f32 %v1248_v18, %v1248_v18  ;;  %v421_v22 = vmul.f32 %v420_v19, %v1242_v14  ;;  %v410_v53 = vmul.f32 %v409_v45, %v1242_v14 }
  0xac   : > { %v1253_v23 = vmin.f32 %v446_v20, 16.0  ;;  %v422_v25 = vadd.f32 0.014752088, %v421_v22  ;;  %v411_v0 = vadd.f32 0.0036580483, %v410_v53 }
  0xad   : > { %v393_v24 = vpop.f32.mrf.mxu0 }
  0xae   : > { %v1255_v26 = vadd.f32 %v393_v24, %v354_v21  ;;  %v459_v27 = vmul.f32 3.8918573e-05, %v1253_v23  ;;  %v423_v28 = vmul.f32 %v422_v25, %v1242_v14  ;;  %v448_v36 = vmul.f32 2.1237322e-06, %v1253_v23 }
  0xaf   : > { %v412_v13 = vmul.f32 %v411_v0, %v1242_v14 }
  0xb0   : > { %v1260_v29 = vmul.f32 0.70710677, %v1255_v26  ;;  %v424_v30 = vadd.f32 0.112945676, %v423_v28  ;;  %v460_v31 = vadd.f32 0.001143296, %v459_v27 }
  0xb1   : > { %v449_v46 = vadd.f32 0.00028619796, %v448_v36  ;;  %v413_v24 = vadd.f32 0.05243302, %v412_v13 }
  0xb2   : > { %v486_v32 = vmul.f32 %v1260_v29, %v1260_v29  ;;  %v461_v34 = vmul.f32 %v460_v31, %v1253_v23  ;;  %v425_v37 = vmul.f32 %v424_v30, %v1242_v14 }
  0xb3   : > { %v450_v54 = vmul.f32 %v449_v46, %v1253_v23  ;;  %v414_v36 = vmul.f32 %v413_v24, %v1242_v14 }
  0xb4   : > { %v1268_v38 = vmin.f32 %v486_v32, 16.0  ;;  %v462_v40 = vadd.f32 0.014752088, %v461_v34  ;;  %v426_v47 = vadd.f32 0.4994258, %v425_v37 }
  0xb5   : > { %v395_v39 = vpop.f32.mrf.mxu0  ;;  %v451_v1 = vadd.f32 0.0036580483, %v450_v54  ;;  %v415_v46 = vadd.f32 0.18741608, %v414_v36 }
  0xb6   : > { %v1270_v41 = vadd.f32 %v395_v39, %v355_v33  ;;  %v488_v42 = vmul.f32 2.1237322e-06, %v1268_v38  ;;  %v499_v43 = vmul.f32 3.8918573e-05, %v1268_v38  ;;  %v463_v44 = vmul.f32 %v462_v40, %v1253_v23 }
  0xb7   : > { %v427_v55 = vmul.f32 %v426_v47, %v1242_v14  ;;  %v452_v19 = vmul.f32 %v451_v1, %v1253_v23 }
  0xb8   : > { %v489_v48 = vadd.f32 0.00028619796, %v488_v42  ;;  %v1276_v49 = vmul.f32 0.70710677, %v1270_v41  ;;  %v500_v50 = vadd.f32 0.001143296, %v499_v43 }
  0xb9   : > { %v464_v51 = vadd.f32 0.112945676, %v463_v44  ;;  %v1290_v2 = vadd.f32 1.0, %v427_v55  ;;  %v453_v28 = vadd.f32 0.05243302, %v452_v19  ;;  %v692_v19 = vld [vmem:[%s1509_s5] sm:$0xff] }
  0xba   : > { %v526_v52 = vmul.f32 %v1276_v49, %v1276_v49  ;;  %v501_v56 = vmul.f32 %v500_v50, %v1268_v38  ;;  %v490_v57 = vmul.f32 %v489_v48, %v1268_v38  ;;  %696 = vperm.xlu2 %997, %v692_v19  }
  0xbb   : > { %v465_v59 = vmul.f32 %v464_v51, %v1253_v23  ;;  %999 = vrcp.f32 %v1290_v2  ;;  %v454_v39 = vmul.f32 %v453_v28, %v1253_v23  ;;  %vm434_vm7 = vweird.f32 %v1290_v2 }
  0xbc   : > { %v1285_v58 = vmin.f32 %v526_v52, 16.0  ;;  %v502_v60 = vadd.f32 0.014752088, %v501_v56  ;;  %v491_v4 = vadd.f32 0.0036580483, %v490_v57  ;;  %v416_v57 = vmul.f32 %v415_v46, %v1242_v14 }
  0xbd   : > { %v466_v62 = vadd.f32 0.4994258, %v465_v59  ;;  %v455_v50 = vadd.f32 0.18741608, %v454_v39  ;;  %v438_v13 = vand.u32 2147483647, %v1290_v2 }
  0xbe   : > { %v528_v61 = vmul.f32 2.1237322e-06, %v1285_v58  ;;  %v539_v63 = vmul.f32 3.8918573e-05, %v1285_v58  ;;  %v503_v3 = vmul.f32 %v502_v60, %v1268_v38  ;;  %v492_v20 = vmul.f32 %v491_v4, %v1268_v38 }
  0xbf   : > { %v467_v6 = vmul.f32 %v466_v62, %v1253_v23  ;;  %v417_v28 = vadd.f32 1.1283791, %v416_v57  ;;  %vm439_vm12 = vcmp.eq.f32.partialorder %v438_v13, 8.507059e+37 }
  0xc0   : > { %v529_v5 = vadd.f32 0.00028619796, %v528_v61  ;;  %v540_v7 = vadd.f32 0.001143296, %v539_v63  ;;  %v504_v8 = vadd.f32 0.112945676, %v503_v3  ;;  %v456_v61 = vmul.f32 %v455_v50, %v1253_v23 }
  0xc1   : > { %v1294_v9 = vadd.f32 1.0, %v467_v6  ;;  %v493_v30 = vadd.f32 0.05243302, %v492_v20  ;;  %v1306_v32 = vpop.eup %999  ;;  %v744_v20 = vld [vmem:[%s1510_s6 + $0x78] sm:$0xff] }
  0xc2   : > { %v541_v12 = vmul.f32 %v540_v7, %v1285_v58  ;;  %v530_v15 = vmul.f32 %v529_v5, %v1285_v58  ;;  %v505_v17 = vmul.f32 %v504_v8, %v1268_v38  ;;  %v430_v42 = vmul.f32 %v1306_v32, %v1290_v2  ;;  %749 = vmatpush.msra.mxu2 %v744_v20 }
  0xc3   : > { %1001 = vrcp.f32 %v1294_v9  ;;  %v494_v40 = vmul.f32 %v493_v30, %v1268_v38  ;;  %vm435_vm1 = vweird.f32 %v1306_v32  ;;  %vm474_vm4 = vweird.f32 %v1294_v9  ;;  %924 = vmatpush.msra.mxu3 %v744_v20 }
  0xc4   : > { %v506_v21 = vadd.f32 0.4994258, %v505_v17  ;;  %v542_v22 = vadd.f32 0.014752088, %v541_v12  ;;  %v531_v25 = vadd.f32 0.0036580483, %v530_v15  ;;  %vm1367_vm10 = vmor %vm434_vm7, %vm435_vm1 }
  0xc5   : > { %v495_v51 = vadd.f32 0.18741608, %v494_v40  ;;  %v431_v52 = vsub.f32 1.0, %v430_v42  ;;  %v478_v23 = vand.u32 2147483647, %v1294_v9  ;;  %v440_v15 = vand.u32 2147483648, %v1290_v2 }
  0xc6   : > { %v507_v27 = vmul.f32 %v506_v21, %v1268_v38  ;;  %v543_v31 = vmul.f32 %v542_v22, %v1285_v58  ;;  %v532_v37 = vmul.f32 %v531_v25, %v1285_v58  ;;  %v457_v21 = vadd.f32 1.1283791, %v456_v61  ;;  %v743_v25 = vld [vmem:[%s1510_s6 + $0x70] sm:$0xff]  ;;  %v741_v40 = vld [vmem:[%s1510_s6 + $0x60] sm:$0xff] }
  0xc7   : > { %v496_v62 = vmul.f32 %v495_v51, %v1268_v38  ;;  %v432_v63 = vmul.f32 %v1306_v32, %v431_v52  ;;  %v480_v38 = vand.u32 2147483648, %v1294_v9  ;;  %vm479_vm11 = vcmp.eq.f32.partialorder %v478_v23, 8.507059e+37  ;;  %750 = vmatpush.msra.mxu2 %v743_v25  ;;  %925 = vmatpush.msra.mxu3 %v743_v25 }
  0xc8   : > { %v508_v33 = vadd.f32 1.0, %v507_v27  ;;  %v544_v35 = vadd.f32 0.112945676, %v543_v31  ;;  %v533_v47 = vadd.f32 0.05243302, %v532_v37  ;;  %v441_v37 = vor.u32 1.1754944e-38, %v440_v15 }
  0xc9   : > { %v1308_v34 = vpop.eup %1001  ;;  %v497_v6 = vadd.f32 1.1283791, %v496_v62  ;;  %v433_v7 = vadd.f32 %v1306_v32, %v432_v63  ;;  %v458_v42 = vmul.f32 %v457_v21, %v1248_v18  ;;  %v398_v15 = vmul.f32 0.5, %v1235_v10  ;;  %v1417_v10 = vld [vmem:[%s1223_s13] sm:$0xff]   ;;  %s882_s13 = sshll.u32 %s328_s25, 4 }
  0xca   : > { %1003 = vrcp.f32 %v508_v33  ;;  %v470_v43 = vmul.f32 %v1308_v34, %v1294_v9  ;;  %v545_v44 = vmul.f32 %v544_v35, %v1285_v58  ;;  %v534_v59 = vmul.f32 %v533_v47, %v1285_v58  ;;  %v742_v35 = vld [vmem:[%s1510_s6 + $0x68] sm:$0xff]  ;;  %s330_s17 = scalar_lea.vmem [#allocation5], %s882_s13 }
  0xcb   : > { %v520_v1 = vand.u32 2147483648, %v508_v33  ;;  %vm475_vm2 = vweird.f32 %v1308_v34  ;;  %v518_v14 = vand.u32 2147483647, %v508_v33  ;;  %vm514_vm5 = vweird.f32 %v508_v33  ;;  %751 = vmatpush.msra.mxu2 %v742_v35  ;;  %v693_v47 = vld [vmem:[%s1509_s5 + $0x8] sm:$0xff]  ;;  %926 = vmatpush.msra.mxu3 %v742_v35  ;;  %s787_s21 = sshll.u32 %s330_s17, 4  ;;  %s788_s21 = int_to_ptr.vmem [resolvable:$true] %s787_s21 }
  0xcc   : > { %v471_v45 = vsub.f32 1.0, %v470_v43  ;;  %v546_v48 = vadd.f32 0.4994258, %v545_v44  ;;  %v535_v5 = vadd.f32 0.18741608, %v534_v59  ;;  %vm1336_vm6 = vmor %vm474_vm4, %vm475_vm2  ;;  %v498_v36 = vmul.f32 %v497_v6, %v1260_v29  ;;  %701 = vperm.xlu2 %997, %v693_v47   ;;  %v738_v59 = vld [vmem:[%s1510_s6 + $0x48] sm:$0xff] }
  0xcd   : > { %v521_v9 = vor.u32 1.1754944e-38, %v520_v1  ;;  %vm519_vm9 = vcmp.eq.f32.partialorder %v518_v14, 8.507059e+37  ;;  %v418_v44 = vmul.f32 %v417_v28, %v1238_v11  ;;  %752 = vmatpush.msra.mxu2 %v741_v40  ;;  %v739_v11 = vld [vmem:[%s1510_s6 + $0x50] sm:$0xff]  ;;  %927 = vmatpush.msra.mxu3 %v741_v40  ;;  %vm711_vm1 = vcmask 261120  }
  0xce   : > { %v547_v54 = vmul.f32 %v546_v48, %v1285_v58  ;;  %v472_v56 = vmul.f32 %v1308_v34, %v471_v45  ;;  %v536_v30 = vmul.f32 %v535_v5, %v1285_v58  ;;  %v437_v58 = vsel %vm1367_vm10, %v1306_v32, %v433_v7  ;;  %v740_v48 = vld [vmem:[%s1510_s6 + $0x58] sm:$0xff]  ;;  %v735_v6 = vld [vmem:[%s1510_s6 + $0x30] sm:$0xff] }
  0xcf   : > { %v442_v45 = vsel %vm439_vm12, %v441_v37, %v437_v58  ;;  %753 = vmatpush.msra.mxu2 %v740_v48  ;;  %928 = vmatpush.msra.mxu3 %v740_v48  ;;  %v401_v7 = vmul.f32 0.5, %v1270_v41  ;;  %v602_v28 = vunpack.c.l.bf16 %v1417_v10 }
  0xd0   : > { %v1004_v53 = vpop.eup %1003  ;;  %v1323_v60 = vadd.f32 1.0, %v547_v54  ;;  %v473_v4 = vadd.f32 %v1308_v34, %v472_v56  ;;  %v537_v32 = vadd.f32 1.1283791, %v536_v30  ;;  %v443_v52 = vmul.f32 %v442_v45, %v418_v44  ;;  %v587_v56 = vpop.permute.xlu0 %586 }
  0xd1   : > { %v510_v55 = vmul.f32 %v1004_v53, %v508_v33  ;;  %vm515_vm3 = vweird.f32 %v1004_v53  ;;  %754 = vmatpush.msra.mxu2 %v739_v11  ;;  %929 = vmatpush.msra.mxu3 %v739_v11  ;;  %v1422_v30 = vmul.f32 0.70710677, %v602_v28 }
  0xd2   : > { %1005 = vrcp.f32 %v1323_v60  ;;  %vm1344_vm8 = vmor %vm514_vm5, %vm515_vm3  ;;  %v477_v24 = vsel %vm1336_vm6, %v1308_v34, %v473_v4  ;;  %v481_v34 = vor.u32 1.1754944e-38, %v480_v38  ;;  %v560_v46 = vand.u32 2147483648, %v1323_v60  ;;  %v736_v4 = vld [vmem:[%s1510_s6 + $0x38] sm:$0xff] }
  0xd3   : > { %v511_v0 = vsub.f32 1.0, %v510_v55  ;;  %v558_v51 = vand.u32 2147483647, %v1323_v60  ;;  %vm554_vm14 = vweird.f32 %v1323_v60  ;;  %v577_v55 = vpop.permute.xlu1 %576  ;;  %v538_v61 = vmul.f32 %v537_v32, %v1276_v49  ;;  %755 = vmatpush.msra.mxu2 %v738_v59  ;;  %930 = vmatpush.msra.mxu3 %v738_v59  ;;  %v732_v32 = vld [vmem:[%s1510_s6 + $0x18] sm:$0xff] }
  0xd4   : > { %v482_v39 = vsel %vm479_vm11, %v481_v34, %v477_v24  ;;  %v561_v57 = vor.u32 1.1754944e-38, %v560_v46  ;;  %v901_v1 = vclamps-f32 %v443_v52, 1.0  ;;  %v400_v49 = vmul.f32 0.5, %v1255_v26  ;;  %v731_v46 = vld [vmem:[%s1510_s6 + $0x10] sm:$0xff] }
  0xd5   : > { %v512_v3 = vmul.f32 %v1004_v53, %v511_v0  ;;  %v483_v18 = vmul.f32 %v482_v39, %v458_v42  ;;  %vm559_vm0 = vcmp.eq.f32.partialorder %v558_v51, 8.507059e+37  ;;  %v399_v38 = vmul.f32 0.5, %v1244_v16 }
  0xd6   : > { %v608_v31 = vmul.f32 %v1422_v30, %v1422_v30 }
  0xd7   : > { %v513_v8 = vadd.f32 %v1004_v53, %v512_v3  ;;  %v902_v62 = vclamps-f32 %v483_v18, 1.0 }
  0xd8   : > { %v1006_v27 = vpop.eup %1005  ;;  %v592_v16 = vpop.permute.xlu0 %591 }
  0xd9   : > { %v517_v22 = vsel %vm1344_vm8, %v1004_v53, %v513_v8  ;;  %v550_v2 = vmul.f32 %v1006_v27, %v1323_v60  ;;  %vm555_vm13 = vweird.f32 %v1006_v27  ;;  %v737_v60 = vld [vmem:[%s1510_s6 + $0x40] sm:$0xff]  ;;  %v567_v5 = vadd.f32 1.0, %v902_v62 }
  0xda   : > { %v522_v33 = vsel %vm519_vm9, %v521_v9, %v517_v22  ;;  %vm556_vm15 = vmor %vm554_vm14, %vm555_vm13  ;;  %756 = vmatpush.msra.mxu2 %v737_v60  ;;  %931 = vmatpush.msra.mxu3 %v737_v60  ;;  %v566_v8 = vadd.f32 1.0, %v901_v1 }
  0xdb   : > { %v523_v43 = vmul.f32 %v522_v33, %v498_v36  ;;  %v551_v29 = vsub.f32 1.0, %v550_v2  ;;  %v571_v26 = vmul.f32 %v567_v5, %v399_v38  ;;  %v582_v9 = vpop.permute.xlu1 %581  ;;  %v609_v33 = vmin.f32 %v608_v31, 16.0 }
  0xdc   : > { %757 = vmatpush.msra.mxu2 %v736_v4  ;;  %932 = vmatpush.msra.mxu3 %v736_v4  ;;  %v570_v19 = vmul.f32 %v566_v8, %v398_v15  ;;  %v603_v36 = vunpack.c.h.bf16 %v1417_v10 }
  0xdd   : > { %v552_v50 = vmul.f32 %v1006_v27, %v551_v29  ;;  %v903_v53 = vclamps-f32 %v523_v43, 1.0  ;;  %v595_v22 = vmul.f32 %v582_v9, %v571_v26  ;;  %v621_v34 = vmul.f32 3.8918573e-05, %v609_v33  ;;  %v734_v43 = vld [vmem:[%s1510_s6 + $0x28] sm:$0xff]  ;;  %v733_v29 = vld [vmem:[%s1510_s6 + $0x20] sm:$0xff] }
  0xde   : > { %758 = vmatpush.msra.mxu2 %v735_v6  ;;  %933 = vmatpush.msra.mxu3 %v735_v6  ;;  %v594_v41 = vmul.f32 %v577_v55, %v570_v19  ;;  %v1429_v58 = vmul.f32 0.70710677, %v603_v36  ;;  %v610_v11 = vmul.f32 2.1237322e-06, %v609_v33  ;;  %v730_v26 = vld [vmem:[%s1510_s6 + $0x8] sm:$0xff] }
  0xdf   : > { %v553_v54 = vadd.f32 %v1006_v27, %v552_v50  ;;  %v568_v3 = vadd.f32 1.0, %v903_v53  ;;  %v622_v35 = vadd.f32 0.001143296, %v621_v34 }
  0xe0   : > { %v600_v25 = vpack.c.bf16 %v595_v22, %v594_v41  ;;  %v648_v37 = vmul.f32 %v1429_v58, %v1429_v58  ;;  %759 = vmatpush.msra.mxu2 %v734_v43  ;;  %934 = vmatpush.msra.mxu3 %v734_v43 }
  0xe1   : > { %v557_v63 = vsel %vm556_vm15, %v1006_v27, %v553_v54  ;;  %v572_v12 = vmul.f32 %v568_v3, %v400_v49  ;;  %v922_v27 = vld [vmem:[%s1507_s3] sm:$0xff]  ;;  %v623_v2 = vmul.f32 %v622_v35, %v609_v33  ;;  %v611_v54 = vadd.f32 0.00028619796, %v610_v11 }
  0xe2   : > { %v562_v0 = vsel %vm559_vm0, %v561_v57, %v557_v63  ;;  %v1433_v39 = vmin.f32 %v648_v37, 16.0  ;;  %760 = vmatpush.msra.mxu2 %v733_v29  ;;  %935 = vmatpush.msra.mxu3 %v733_v29 }
  0xe3   : > { %v563_v14 = vmul.f32 %v562_v0, %v538_v61  ;;  %v596_v20 = vmul.f32 %v587_v56, %v572_v12  ;;  %v624_v40 = vadd.f32 0.014752088, %v623_v2  ;;  %v612_v57 = vmul.f32 %v611_v54, %v609_v33 }
  0xe4   : > { %v661_v42 = vmul.f32 3.8918573e-05, %v1433_v39  ;;  %761 = vmatpush.msra.mxu2 %v732_v32  ;;  %936 = vmatpush.msra.mxu3 %v732_v32  ;;  %v650_v61 = vmul.f32 2.1237322e-06, %v1433_v39 }
  0xe5   : > { %v904_v23 = vclamps-f32 %v563_v14, 1.0  ;;  %v625_v44 = vmul.f32 %v624_v40, %v609_v33  ;;  %v613_v63 = vadd.f32 0.0036580483, %v612_v57 }
  0xe6   : > { %v662_v45 = vadd.f32 0.001143296, %v661_v42  ;;  %762 = vmatpush.msra.mxu2 %v731_v46  ;;  %937 = vmatpush.msra.mxu3 %v731_v46  ;;  %v651_v0 = vadd.f32 0.00028619796, %v650_v61  ;;  %v998_v61 = vld [vmem:[%s1511_s7] ss:$0 sm:$0xff] }
  0xe7   : > { %v569_v13 = vadd.f32 1.0, %v904_v23  ;;  %v626_v48 = vadd.f32 0.112945676, %v625_v44  ;;  %v614_v1 = vmul.f32 %v613_v63, %v609_v33 }
  0xe8   : > { %v663_v47 = vmul.f32 %v662_v45, %v1433_v39  ;;  %v652_v3 = vmul.f32 %v651_v0, %v1433_v39  ;;  %763 = vmatpush.msra.mxu2 %v730_v26  ;;  %938 = vmatpush.msra.mxu3 %v730_v26 }
  0xe9   : > { %v573_v17 = vmul.f32 %v569_v13, %v401_v7  ;;  %v627_v50 = vmul.f32 %v626_v48, %v609_v33  ;;  %v615_v49 = vadd.f32 0.05243302, %v614_v1 }
  0xea   : > { %v664_v18 = vadd.f32 0.014752088, %v663_v47  ;;  %v653_v23 = vadd.f32 0.0036580483, %v652_v3 }
  0xeb   : > { %v597_v21 = vmul.f32 %v592_v16, %v573_v17  ;;  %v628_v52 = vadd.f32 0.4994258, %v627_v50  ;;  %v616_v38 = vmul.f32 %v615_v49, %v609_v33  ;;  %v729_v16 = vld [vmem:[%s1510_s6] sm:$0xff] }
  0xec   : > { %v665_v51 = vmul.f32 %v664_v18, %v1433_v39  ;;  %v654_v7 = vmul.f32 %v653_v23, %v1433_v39  ;;  %764 = vmatpush.msra.mxu2 %v729_v16  ;;  %939 = vmatpush.msra.mxu3 %v729_v16 }
  0xed   : > { %v601_v24 = vpack.c.bf16 %v597_v21, %v596_v20  ;;  %v629_v55 = vmul.f32 %v628_v52, %v609_v33  ;;  %v617_v8 = vadd.f32 0.18741608, %v616_v38  ;;  %v605_v52 = vmul.f32 0.5, %v603_v36 }
  0xee   : > { %v666_v53 = vadd.f32 0.112945676, %v665_v51  ;;  %v655_v15 = vadd.f32 0.05243302, %v654_v7 }
  0xef   : > { %721 = vmatpush.bf16.msra.mxu1 %v601_v24  ;;  %v630_v59 = vadd.f32 1.0, %v629_v55  ;;  %v618_v17 = vmul.f32 %v617_v8, %v609_v33 }
  0xf0   : > { %v667_v56 = vmul.f32 %v666_v53, %v1433_v39  ;;  %v656_v22 = vmul.f32 %v655_v15, %v1433_v39 }
  0xf1   : > { %1007 = vrcp.f32 %v630_v59  ;;  %vm636_vm2 = vweird.f32 %v630_v59  ;;  %v642_v19 = vand.u32 2147483648, %v630_v59  ;;  %v640_v21 = vand.u32 2147483647, %v630_v59 }
  0xf2   : > { %v668_v62 = vadd.f32 0.4994258, %v667_v56  ;;  %v619_v24 = vadd.f32 1.1283791, %v618_v17  ;;  %v657_v31 = vadd.f32 0.18741608, %v656_v22 }
  0xf3   : > { %722 = vmatpush.bf16.msra.mxu1 %v600_v25  ;;  %v643_v25 = vor.u32 1.1754944e-38, %v642_v19  ;;  %vm641_vm5 = vcmp.eq.f32.partialorder %v640_v21, 8.507059e+37 }
  0xf4   : > { %v669_v60 = vmul.f32 %v668_v62, %v1433_v39  ;;  %v620_v33 = vmul.f32 %v619_v24, %v1422_v30  ;;  %v658_v2 = vmul.f32 %v657_v31, %v1433_v39  ;;  %v604_v30 = vmul.f32 0.5, %v602_v28 }
  0xf6   : > { %911 = vmatmul.msk.bf16.vlgmr.msra.gmra.mxu1 %vm711_vm1, %v922_v27  ;;  %v670_v4 = vadd.f32 1.0, %v669_v60  ;;  %v659_v29 = vadd.f32 1.1283791, %v658_v2 }
  0xf7   : > { %v1008_v14 = vpop.eup %1007 }
  0xf8   : > { %v632_v5 = vmul.f32 %v1008_v14, %v630_v59  ;;  %1009 = vrcp.f32 %v670_v4  ;;  %vm637_vm3 = vweird.f32 %v1008_v14  ;;  %vm676_vm6 = vweird.f32 %v670_v4 }
  0xf9   : > { %vm638_vm4 = vmor %vm636_vm2, %vm637_vm3  ;;  %v682_v37 = vand.u32 2147483648, %v670_v4  ;;  %v680_v43 = vand.u32 2147483647, %v670_v4  ;;  %v660_v46 = vmul.f32 %v659_v29, %v1429_v58 }
  0xfa   : > { %v633_v6 = vsub.f32 1.0, %v632_v5 }
  0xfb   : > { %v683_v44 = vor.u32 1.1754944e-38, %v682_v37  ;;  %vm681_vm9 = vcmp.eq.f32.partialorder %v680_v43, 8.507059e+37 }
  0xfc   : > { %v634_v13 = vmul.f32 %v1008_v14, %v633_v6 }
  0xfe   : > { %v1010_v12 = vpop.eup %1009  ;;  %v635_v20 = vadd.f32 %v1008_v14, %v634_v13 }
  0xff   : > { %v672_v9 = vmul.f32 %v1010_v12, %v670_v4  ;;  %vm677_vm7 = vweird.f32 %v1010_v12 }
 0x100   : > { %v639_v27 = vsel %vm638_vm4, %v1008_v14, %v635_v20  ;;  %vm678_vm8 = vmor %vm676_vm6, %vm677_vm7 }
 0x101   : > { %v673_v41 = vsub.f32 1.0, %v672_v9  ;;  %v644_v35 = vsel %vm641_vm5, %v643_v25, %v639_v27 }
 0x102   : > { %v645_v40 = vmul.f32 %v644_v35, %v620_v33 }
 0x103   : > { %v674_v34 = vmul.f32 %v1010_v12, %v673_v41 }
 0x104   : > { %v905_v32 = vclamps-f32 %v645_v40, 1.0 }
 0x105   : > { %v675_v42 = vadd.f32 %v1010_v12, %v674_v34 }
 0x106   : > { %v688_v48 = vadd.f32 1.0, %v905_v32 }
 0x107   : > { %v679_v45 = vsel %vm678_vm8, %v1010_v12, %v675_v42 }
 0x108   : > { %v684_v47 = vsel %vm681_vm9, %v683_v44, %v679_v45  ;;  %v690_v18 = vmul.f32 %v688_v48, %v604_v30 }
 0x109   : > { %v685_v39 = vmul.f32 %v684_v47, %v660_v46 }
 0x10b   : > { %v906_v51 = vclamps-f32 %v685_v39, 1.0 }
 0x10d   : > { %v689_v53 = vadd.f32 1.0, %v906_v51 }
 0x10f   : > { %v691_v56 = vmul.f32 %v689_v53, %v605_v52 }
 0x114   : > { %v697_v50 = vpop.permute.xlu2 %696 }
 0x115   : > { %v704_v11 = vmul.f32 %v697_v50, %v690_v18 }
 0x126   : > { %v702_v58 = vpop.permute.xlu2 %701 }
 0x127   : > { %v705_v57 = vmul.f32 %v702_v58, %v691_v56 }
 0x173   : > { %v724_v54 = vpop.f32.mrf.mxu1 }
 0x174   : > { %v725_v55 = vadd.f32 %v724_v54, %v704_v11 }
 0x176   : > { %765 = vmatmul.f32.vlgmr.msra.gmra.mxu2 %v725_v55 }
 0x17b   : > { %v726_v59 = vpop.f32.mrf.mxu1 }
 0x17c   : > { %v727_v28 = vadd.f32 %v726_v59, %v705_v57 }
 0x17e   : > { %768 = vmatmul.f32.vlgmr.msra.gmra.mxu3 %v727_v28 }
 0x1f9   : > { %v766_v62 = vpop.f32.mrf.mxu2 }
 0x1fa   : > { %v767_v10 = vadd.f32 %v998_v61, %v766_v62 }
 0x1fc   : > { %772 = vst [vmem:[%s330_s17] sm:$0xff] %v767_v10 }
 0x201   : > { %v769_v36 = vpop.f32.mrf.mxu3 }
 0x202   : > { %v770_v63 = vadd.f32 %v998_v61, %v769_v36 }
 0x204   : > { %773 = vst [vmem:[%s330_s17 + $0x8] sm:$0xff] %v770_v63 }
 0x205   : > { %1068 = shalt.err (!%p1065_p8)
}
 0x206   : > { %s1113_s25 = smov 128   ;;  %s1114_s17 = smov 8  }
 0x207   : > { %944 = dma.vmem_to_hbm [thread:$0]  (%p1198_p5), %s788_s21, 256, %s790_s22, %s775_s23, %s1113_s25, %s1113_s25, %s1114_s17  }
 0x208 PF: > { %p956_p9 = scmp.ge.s32.totalorder %s1107_s30, 2  ;;  %s804_s19 = sand.u32 1, %s1095_s27  }
 0x209   : > { %s805_s20 = scalar_lea.sflag [#allocation4], %s804_s19 }
 0x20a   : > { %p951_p10 = pnand %p956_p9, %p1202_p6 }
 0x20c   : > { %p952_p11 = pneg %p951_p10 }
 0x20e   : > { %1090 = dma.done.wait (%p952_p11), %s805_s20, 256  }
 0x20f   : > { %1092 = vsyncadd (%p952_p11), %s805_s20, 4294967040  ;;  %p19_p12 = scmp.ge.s32.totalorder %s1185_s11, 6   ;;  %s1521_s27 = smov %s1099_s28 }
 0x210   : > { %s1522_s28 = smov %s1103_s29  ;;  %s1523_s29 = smov %s1196_s14 }
 0x211   : > { %s1524_s30 = smov %s1185_s11  ;;  %21 = sbr.rel (!%p19_p12) target bundleno = 4 (0x4), region = 95 }
 0x216   :  { %811 = vsyncpa [#allocation3], 1 }
 0x217   :  { %813 = vsyncpa [#allocation3 + $0x1], 1 }
 0x218   :  { %814 = vsyncpa [#allocation4], 1 }
 0x219   :  { %816 = vsyncpa [#allocation4 + $0x1], 1 }

// kernel: tpu_custom_call.1
= control target key start
LH: loop header
LB: loop body
LE: loop exit
PB: predicated region body
PF: predicated region fallthrough
CT: control target
= control target key end

     0   :  { %13 = vsyncpa [#allocation3], 0  ;;  %s1504_s0 = inlined_call_operand.vmem [shape: bf16[4,16,128], index: 0, kind: input, shape index: {}]   ;;  %s1505_s1 = inlined_call_operand.vmem [shape: f32[4,32,1], index: 1, kind: input, shape index: {}]   ;;  %s1506_s2 = inlined_call_operand.vmem [shape: bf16[32,16], index: 2, kind: input, shape index: {}]   ;;  %s1507_s3 = inlined_call_operand.vmem [shape: bf16[16,32], index: 3, kind: input, shape index: {}]   ;;  %s1508_s4 = inlined_call_operand.hbm [shape: f32[32,128], index: 4, kind: input, shape index: {}]   ;;  %s1509_s5 = inlined_call_operand.vmem [shape: f32[16,1], index: 5, kind: input, shape index: {}]   ;;  %s1510_s6 = inlined_call_operand.vmem [shape: f32[128,128], index: 6, kind: input, shape index: {}]   ;;  %s1511_s7 = inlined_call_operand.vmem [shape: f32[1,128], index: 7, kind: input, shape index: {}]   ;;  %s1512_s8 = inlined_call_operand.hbm [shape: f32[4,16,128], index: 8, kind: output, shape index: {}]  }
   0x1   :  { %14 = vsyncpa [#allocation4], 0 }
   0x2   :  { %16 = vsyncpa [#allocation4 + $0x1], 0  ;;  %s1160_s27 = smov 0   ;;  %s1162_s28 = smov 0  }
   0x3   :  { %s1164_s29 = smov 0   ;;  %s1166_s30 = smov 0  }
   0x4 LB: > { %s1181_s9 = sadd.s32 4294967295, %s1107_s30   ;;  %s876_s10 = sadd.s32 4294967294, %s1107_s30   ;;  %s1107_s30 = sphi %s1166_s30, %s1524_s30   ;;  %s1103_s29 = sphi %s1164_s29, %s1523_s29   ;;  %s1099_s28 = sphi %s1162_s28, %s1522_s28   ;;  %s1095_s27 = sphi %s1160_s27, %s1521_s27  }
   0x5   : > { %s1185_s11 = sadd.s32 1, %s1107_s30   ;;  %s207_s12 = sadd.s32 1, %s1103_s29 }
   0x6   : > { %s204_s13 = ssub.s32 %s1107_s30, %s1185_s11  ;;  %p217_p0 = scmp.ne.s32.totalorder %s1103_s29, %s1099_s28 }
   0x7   : > { %p205_p1 = scmp.eq.s32.totalorder %s204_s13, 0  ;;  %p218_p2 = scmp.eq.s32.totalorder %s1181_s9, 3 }
   0x8   : > { %p223_p3 = scmp.ne.s32.totalorder %s1099_s28, %s1095_s27  ;;  %p224_p4 = scmp.eq.s32.totalorder %s876_s10, 3 }
   0x9   : > { %s1196_s14 = scalar_select %p205_p1, %s1103_s29, %s207_s12  }
   0xa   : > { %p1198_p5 = por %p218_p2, %p217_p0  ;;  %p1202_p6 = por %p224_p4, %p223_p3 }
   0xb   : > { %p877_p7 = scmp.ge.s32.totalorder %s1107_s30, 1  ;;  %p231_p8 = scmp.lt.s32.totalorder %s1107_s30, 5 }
   0xc   : > { %p954_p9 = scmp.eq.s32.totalorder %s1181_s9, 0  ;;  %s248_s19 = sshll.u32 %s1508_s4, 4  ;;  %s249_s19 = int_to_ptr.hbm [resolvable:$true] %s248_s19 }
   0xd   : > { %p232_p10 = pnand %p877_p7, %p231_p8  ;;  %s1109_s20 = smov [#allocation2]  }
   0xe   : > { %s250_s21 = sshll.u32 %s1109_s20, 4  ;;  %s1110_s22 = smov 128   ;;  %s251_s21 = int_to_ptr.vmem [resolvable:$true] %s250_s21 }
   0xf   : > { %p946_p11 = pneg %p232_p10  ;;  %s1111_s23 = smov 8  }
  0x10   : > { %291 = sbr.rel (%p232_p10) target bundleno = 520 (0x208), region = 52 }
  0x11   : > { %p947_p12 = pnand %p954_p9, %p946_p11 }
  0x13   : > { %949 = dma.hbm_to_vmem [thread:$0]  (!%p947_p12), %s249_s19, 512, %s251_s21, [#allocation3], %s1110_s22, %s1110_s22, %s1111_s23  }
  0x15   : > { %1086 = dma.done.wait (%p954_p9), [#allocation3], 512  }
  0x16   : > { %1088 = vsyncadd (%p954_p9), [#allocation3], 4294966784  ;;  %p331_p13 = scmp.lt.s32.totalorder %s1181_s9, 3  ;;  %v1112_v0 = vmov 0   ;;  %v920_v2 = vld [vmem:[%s1506_s2] sm:$0xff]  ;;  %vm372_vm0 = vcmask 130048  }
  0x17   : > { %996 = vset.pattern.permute.xlu1 %v1112_v0  ;;  %995 = vset.pattern.permute.xlu0 %v1112_v0  ;;  %v921_v7 = vld [vmem:[%s1506_s2 + $0x8] sm:$0xff]  ;;  %v352_v8 = vld [vmem:[#allocation2] sm:$0xff]  ;;  %v354_v21 = vld [vmem:[#allocation2 + $0x10] sm:$0xff]  ;;  %s923_s12 = sshll.u32 %s1181_s9, 4  ;;  %s1061_s10 = scalar_lea.hbm %s1512_s8, 64 }
  0x18   : > { %s332_s24 = scalar_select %p331_p13, %s1181_s9, 3  ;;  %997 = vset.pattern.permute.xlu2 %v1112_v0  ;;  %v353_v13 = vld [vmem:[#allocation2 + $0x8] sm:$0xff]  ;;  %v355_v33 = vld [vmem:[#allocation2 + $0x18] sm:$0xff] }
  0x19   : > { %s786_s20 = scalar_lea.hbm %s1512_s8, %s923_s12 }
  0x1a   : > { %s917_s25 = sshll.u32 %s332_s24, 3  ;;  %s918_s26 = sshll.u32 %s332_s24, 5 }
  0x1b   : > { %s1223_s13 = scalar_lea.vmem %s1504_s0, %s917_s25  ;;  %s340_s19 = scalar_lea.vmem %s1505_s1, %s918_s26 }
  0x1c   : > { %v919_v1 = vld [vmem:[%s1223_s13] sm:$0xff]  ;;  %v346_v4 = vld [vmem:[%s340_s19 + $0x10] sm:$0xff]  ;;  %v345_v5 = vld [vmem:[%s340_s19 + $0x8] sm:$0xff]  ;;  %s328_s25 = sand.u32 1, %s1099_s28   ;;  %s789_s22 = sshll.u32 %s786_s20, 4  ;;  %s790_s22 = int_to_ptr.hbm [resolvable:$true] %s789_s22 }
  0x1d   : > { %v344_v3 = vld [vmem:[%s340_s19] sm:$0xff]  ;;  %386 = vmatpush.bf16.msra.mxu0 %v919_v1  ;;  %586 = vperm.xlu0 %995, %v346_v4   ;;  %v347_v6 = vld [vmem:[%s340_s19 + $0x18] sm:$0xff]  ;;  %s775_s23 = scalar_lea.sflag [#allocation4], %s328_s25  ;;  %s1055_s24 = sshra.s32 %s790_s22, 4  ;;  %s1056_s24 = int_to_ptr.hbm [resolvable:$true] %s1055_s24 }
  0x1e   : > { %576 = vperm.xlu1 %996, %v344_v3   ;;  %s1057_s26 = scalar_lea.hbm %s1056_s24, 16  ;;  %p1062_p3 = scmp.lt.s32.totalorder %s1056_s24, %s1512_s8 }
  0x1f   : > { %p1058_p0 = scmp.ne.s32.totalorder %s1056_s24, %s1057_s26  ;;  %p1063_p4 = scmp.lt.s32.totalorder %s1061_s10, %s1057_s26 }
  0x20   : > { %899 = vmatmul.msk.bf16.vlgmr.msra.gmra.mxu0 %vm372_vm0, %v920_v2 }
  0x21   : > { %p1059_p1 = pnand %p1058_p0, %p1198_p5  ;;  %p1064_p7 = por %p1063_p4, %p1062_p3 }
  0x23   : > { %p1060_p2 = pneg %p1059_p1 }
  0x25   : > { %591 = vperm.xlu0 %995, %v347_v6   ;;  %p1065_p8 = pnand %p1064_p7, %p1060_p2 }
  0x26   : > { %581 = vperm.xlu1 %996, %v345_v5  }
  0x30   : > { %900 = vmatmul.msk.bf16.gmra.mxu0 %vm372_vm0, %v921_v7 }
  0x9d   : > { %v388_v9 = vpop.f32.mrf.mxu0 }
  0x9e   : > { %v1235_v10 = vadd.f32 %v388_v9, %v352_v8 }
  0xa0   : > { %v1238_v11 = vmul.f32 0.70710677, %v1235_v10 }
  0xa2   : > { %v406_v12 = vmul.f32 %v1238_v11, %v1238_v11 }
  0xa4   : > { %v1242_v14 = vmin.f32 %v406_v12, 16.0 }
  0xa5   : > { %v390_v15 = vpop.f32.mrf.mxu0 }
  0xa6   : > { %v1244_v16 = vadd.f32 %v390_v15, %v353_v13  ;;  %v419_v17 = vmul.f32 3.8918573e-05, %v1242_v14  ;;  %v408_v35 = vmul.f32 2.1237322e-06, %v1242_v14 }
  0xa8   : > { %v1248_v18 = vmul.f32 0.70710677, %v1244_v16  ;;  %v420_v19 = vadd.f32 0.001143296, %v419_v17  ;;  %v409_v45 = vadd.f32 0.00028619796, %v408_v35 }
  0xaa   : > { %v446_v20 = vmul.f32 %v1248_v18, %v1248_v18  ;;  %v421_v22 = vmul.f32 %v420_v19, %v1242_v14  ;;  %v410_v53 = vmul.f32 %v409_v45, %v1242_v14 }
  0xac   : > { %v1253_v23 = vmin.f32 %v446_v20, 16.0  ;;  %v422_v25 = vadd.f32 0.014752088, %v421_v22  ;;  %v411_v0 = vadd.f32 0.0036580483, %v410_v53 }
  0xad   : > { %v393_v24 = vpop.f32.mrf.mxu0 }
  0xae   : > { %v1255_v26 = vadd.f32 %v393_v24, %v354_v21  ;;  %v459_v27 = vmul.f32 3.8918573e-05, %v1253_v23  ;;  %v423_v28 = vmul.f32 %v422_v25, %v1242_v14  ;;  %v448_v36 = vmul.f32 2.1237322e-06, %v1253_v23 }
  0xaf   : > { %v412_v13 = vmul.f32 %v411_v0, %v1242_v14 }
  0xb0   : > { %v1260_v29 = vmul.f32 0.70710677, %v1255_v26  ;;  %v424_v30 = vadd.f32 0.112945676, %v423_v28  ;;  %v460_v31 = vadd.f32 0.001143296, %v459_v27 }
  0xb1   : > { %v449_v46 = vadd.f32 0.00028619796, %v448_v36  ;;  %v413_v24 = vadd.f32 0.05243302, %v412_v13 }
  0xb2   : > { %v486_v32 = vmul.f32 %v1260_v29, %v1260_v29  ;;  %v461_v34 = vmul.f32 %v460_v31, %v1253_v23  ;;  %v425_v37 = vmul.f32 %v424_v30, %v1242_v14 }
  0xb3   : > { %v450_v54 = vmul.f32 %v449_v46, %v1253_v23  ;;  %v414_v36 = vmul.f32 %v413_v24, %v1242_v14 }
  0xb4   : > { %v1268_v38 = vmin.f32 %v486_v32, 16.0  ;;  %v462_v40 = vadd.f32 0.014752088, %v461_v34  ;;  %v426_v47 = vadd.f32 0.4994258, %v425_v37 }
  0xb5   : > { %v395_v39 = vpop.f32.mrf.mxu0  ;;  %v451_v1 = vadd.f32 0.0036580483, %v450_v54  ;;  %v415_v46 = vadd.f32 0.18741608, %v414_v36 }
  0xb6   : > { %v1270_v41 = vadd.f32 %v395_v39, %v355_v33  ;;  %v488_v42 = vmul.f32 2.1237322e-06, %v1268_v38  ;;  %v499_v43 = vmul.f32 3.8918573e-05, %v1268_v38  ;;  %v463_v44 = vmul.f32 %v462_v40, %v1253_v23 }
  0xb7   : > { %v427_v55 = vmul.f32 %v426_v47, %v1242_v14  ;;  %v452_v19 = vmul.f32 %v451_v1, %v1253_v23 }
  0xb8   : > { %v489_v48 = vadd.f32 0.00028619796, %v488_v42  ;;  %v1276_v49 = vmul.f32 0.70710677, %v1270_v41  ;;  %v500_v50 = vadd.f32 0.001143296, %v499_v43 }
  0xb9   : > { %v464_v51 = vadd.f32 0.112945676, %v463_v44  ;;  %v1290_v2 = vadd.f32 1.0, %v427_v55  ;;  %v453_v28 = vadd.f32 0.05243302, %v452_v19  ;;  %v692_v19 = vld [vmem:[%s1509_s5] sm:$0xff] }
  0xba   : > { %v526_v52 = vmul.f32 %v1276_v49, %v1276_v49  ;;  %v501_v56 = vmul.f32 %v500_v50, %v1268_v38  ;;  %v490_v57 = vmul.f32 %v489_v48, %v1268_v38  ;;  %696 = vperm.xlu2 %997, %v692_v19  }
  0xbb   : > { %v465_v59 = vmul.f32 %v464_v51, %v1253_v23  ;;  %999 = vrcp.f32 %v1290_v2  ;;  %v454_v39 = vmul.f32 %v453_v28, %v1253_v23  ;;  %vm434_vm7 = vweird.f32 %v1290_v2 }
  0xbc   : > { %v1285_v58 = vmin.f32 %v526_v52, 16.0  ;;  %v502_v60 = vadd.f32 0.014752088, %v501_v56  ;;  %v491_v4 = vadd.f32 0.0036580483, %v490_v57  ;;  %v416_v57 = vmul.f32 %v415_v46, %v1242_v14 }
  0xbd   : > { %v466_v62 = vadd.f32 0.4994258, %v465_v59  ;;  %v455_v50 = vadd.f32 0.18741608, %v454_v39  ;;  %v438_v13 = vand.u32 2147483647, %v1290_v2 }
  0xbe   : > { %v528_v61 = vmul.f32 2.1237322e-06, %v1285_v58  ;;  %v539_v63 = vmul.f32 3.8918573e-05, %v1285_v58  ;;  %v503_v3 = vmul.f32 %v502_v60, %v1268_v38  ;;  %v492_v20 = vmul.f32 %v491_v4, %v1268_v38 }
  0xbf   : > { %v467_v6 = vmul.f32 %v466_v62, %v1253_v23  ;;  %v417_v28 = vadd.f32 1.1283791, %v416_v57  ;;  %vm439_vm12 = vcmp.eq.f32.partialorder %v438_v13, 8.507059e+37 }
  0xc0   : > { %v529_v5 = vadd.f32 0.00028619796, %v528_v61  ;;  %v540_v7 = vadd.f32 0.001143296, %v539_v63  ;;  %v504_v8 = vadd.f32 0.112945676, %v503_v3  ;;  %v456_v61 = vmul.f32 %v455_v50, %v1253_v23 }
  0xc1   : > { %v1294_v9 = vadd.f32 1.0, %v467_v6  ;;  %v493_v30 = vadd.f32 0.05243302, %v492_v20  ;;  %v1306_v32 = vpop.eup %999  ;;  %v744_v20 = vld [vmem:[%s1510_s6 + $0x78] sm:$0xff] }
  0xc2   : > { %v541_v12 = vmul.f32 %v540_v7, %v1285_v58  ;;  %v530_v15 = vmul.f32 %v529_v5, %v1285_v58  ;;  %v505_v17 = vmul.f32 %v504_v8, %v1268_v38  ;;  %v430_v42 = vmul.f32 %v1306_v32, %v1290_v2  ;;  %749 = vmatpush.msra.mxu2 %v744_v20 }
  0xc3   : > { %1001 = vrcp.f32 %v1294_v9  ;;  %v494_v40 = vmul.f32 %v493_v30, %v1268_v38  ;;  %vm435_vm1 = vweird.f32 %v1306_v32  ;;  %vm474_vm4 = vweird.f32 %v1294_v9  ;;  %924 = vmatpush.msra.mxu3 %v744_v20 }
  0xc4   : > { %v506_v21 = vadd.f32 0.4994258, %v505_v17  ;;  %v542_v22 = vadd.f32 0.014752088, %v541_v12  ;;  %v531_v25 = vadd.f32 0.0036580483, %v530_v15  ;;  %vm1367_vm10 = vmor %vm434_vm7, %vm435_vm1 }
  0xc5   : > { %v495_v51 = vadd.f32 0.18741608, %v494_v40  ;;  %v431_v52 = vsub.f32 1.0, %v430_v42  ;;  %v478_v23 = vand.u32 2147483647, %v1294_v9  ;;  %v440_v15 = vand.u32 2147483648, %v1290_v2 }
  0xc6   : > { %v507_v27 = vmul.f32 %v506_v21, %v1268_v38  ;;  %v543_v31 = vmul.f32 %v542_v22, %v1285_v58  ;;  %v532_v37 = vmul.f32 %v531_v25, %v1285_v58  ;;  %v457_v21 = vadd.f32 1.1283791, %v456_v61  ;;  %v743_v25 = vld [vmem:[%s1510_s6 + $0x70] sm:$0xff]  ;;  %v741_v40 = vld [vmem:[%s1510_s6 + $0x60] sm:$0xff] }
  0xc7   : > { %v496_v62 = vmul.f32 %v495_v51, %v1268_v38  ;;  %v432_v63 = vmul.f32 %v1306_v32, %v431_v52  ;;  %v480_v38 = vand.u32 2147483648, %v1294_v9  ;;  %vm479_vm11 = vcmp.eq.f32.partialorder %v478_v23, 8.507059e+37  ;;  %750 = vmatpush.msra.mxu2 %v743_v25  ;;  %925 = vmatpush.msra.mxu3 %v743_v25 }
  0xc8   : > { %v508_v33 = vadd.f32 1.0, %v507_v27  ;;  %v544_v35 = vadd.f32 0.112945676, %v543_v31  ;;  %v533_v47 = vadd.f32 0.05243302, %v532_v37  ;;  %v441_v37 = vor.u32 1.1754944e-38, %v440_v15 }
  0xc9   : > { %v1308_v34 = vpop.eup %1001  ;;  %v497_v6 = vadd.f32 1.1283791, %v496_v62  ;;  %v433_v7 = vadd.f32 %v1306_v32, %v432_v63  ;;  %v458_v42 = vmul.f32 %v457_v21, %v1248_v18  ;;  %v398_v15 = vmul.f32 0.5, %v1235_v10  ;;  %v1417_v10 = vld [vmem:[%s1223_s13] sm:$0xff]   ;;  %s882_s13 = sshll.u32 %s328_s25, 4 }
  0xca   : > { %1003 = vrcp.f32 %v508_v33  ;;  %v470_v43 = vmul.f32 %v1308_v34, %v1294_v9  ;;  %v545_v44 = vmul.f32 %v544_v35, %v1285_v58  ;;  %v534_v59 = vmul.f32 %v533_v47, %v1285_v58  ;;  %v742_v35 = vld [vmem:[%s1510_s6 + $0x68] sm:$0xff]  ;;  %s330_s17 = scalar_lea.vmem [#allocation5], %s882_s13 }
  0xcb   : > { %v520_v1 = vand.u32 2147483648, %v508_v33  ;;  %vm475_vm2 = vweird.f32 %v1308_v34  ;;  %v518_v14 = vand.u32 2147483647, %v508_v33  ;;  %vm514_vm5 = vweird.f32 %v508_v33  ;;  %751 = vmatpush.msra.mxu2 %v742_v35  ;;  %v693_v47 = vld [vmem:[%s1509_s5 + $0x8] sm:$0xff]  ;;  %926 = vmatpush.msra.mxu3 %v742_v35  ;;  %s787_s21 = sshll.u32 %s330_s17, 4  ;;  %s788_s21 = int_to_ptr.vmem [resolvable:$true] %s787_s21 }
  0xcc   : > { %v471_v45 = vsub.f32 1.0, %v470_v43  ;;  %v546_v48 = vadd.f32 0.4994258, %v545_v44  ;;  %v535_v5 = vadd.f32 0.18741608, %v534_v59  ;;  %vm1336_vm6 = vmor %vm474_vm4, %vm475_vm2  ;;  %v498_v36 = vmul.f32 %v497_v6, %v1260_v29  ;;  %701 = vperm.xlu2 %997, %v693_v47   ;;  %v738_v59 = vld [vmem:[%s1510_s6 + $0x48] sm:$0xff] }
  0xcd   : > { %v521_v9 = vor.u32 1.1754944e-38, %v520_v1  ;;  %vm519_vm9 = vcmp.eq.f32.partialorder %v518_v14, 8.507059e+37  ;;  %v418_v44 = vmul.f32 %v417_v28, %v1238_v11  ;;  %752 = vmatpush.msra.mxu2 %v741_v40  ;;  %v739_v11 = vld [vmem:[%s1510_s6 + $0x50] sm:$0xff]  ;;  %927 = vmatpush.msra.mxu3 %v741_v40  ;;  %vm711_vm1 = vcmask 261120  }
  0xce   : > { %v547_v54 = vmul.f32 %v546_v48, %v1285_v58  ;;  %v472_v56 = vmul.f32 %v1308_v34, %v471_v45  ;;  %v536_v30 = vmul.f32 %v535_v5, %v1285_v58  ;;  %v437_v58 = vsel %vm1367_vm10, %v1306_v32, %v433_v7  ;;  %v740_v48 = vld [vmem:[%s1510_s6 + $0x58] sm:$0xff]  ;;  %v735_v6 = vld [vmem:[%s1510_s6 + $0x30] sm:$0xff] }
  0xcf   : > { %v442_v45 = vsel %vm439_vm12, %v441_v37, %v437_v58  ;;  %753 = vmatpush.msra.mxu2 %v740_v48  ;;  %928 = vmatpush.msra.mxu3 %v740_v48  ;;  %v401_v7 = vmul.f32 0.5, %v1270_v41  ;;  %v602_v28 = vunpack.c.l.bf16 %v1417_v10 }
  0xd0   : > { %v1004_v53 = vpop.eup %1003  ;;  %v1323_v60 = vadd.f32 1.0, %v547_v54  ;;  %v473_v4 = vadd.f32 %v1308_v34, %v472_v56  ;;  %v537_v32 = vadd.f32 1.1283791, %v536_v30  ;;  %v443_v52 = vmul.f32 %v442_v45, %v418_v44  ;;  %v587_v56 = vpop.permute.xlu0 %586 }
  0xd1   : > { %v510_v55 = vmul.f32 %v1004_v53, %v508_v33  ;;  %vm515_vm3 = vweird.f32 %v1004_v53  ;;  %754 = vmatpush.msra.mxu2 %v739_v11  ;;  %929 = vmatpush.msra.mxu3 %v739_v11  ;;  %v1422_v30 = vmul.f32 0.70710677, %v602_v28 }
  0xd2   : > { %1005 = vrcp.f32 %v1323_v60  ;;  %vm1344_vm8 = vmor %vm514_vm5, %vm515_vm3  ;;  %v477_v24 = vsel %vm1336_vm6, %v1308_v34, %v473_v4  ;;  %v481_v34 = vor.u32 1.1754944e-38, %v480_v38  ;;  %v560_v46 = vand.u32 2147483648, %v1323_v60  ;;  %v736_v4 = vld [vmem:[%s1510_s6 + $0x38] sm:$0xff] }
  0xd3   : > { %v511_v0 = vsub.f32 1.0, %v510_v55  ;;  %v558_v51 = vand.u32 2147483647, %v1323_v60  ;;  %vm554_vm14 = vweird.f32 %v1323_v60  ;;  %v577_v55 = vpop.permute.xlu1 %576  ;;  %v538_v61 = vmul.f32 %v537_v32, %v1276_v49  ;;  %755 = vmatpush.msra.mxu2 %v738_v59  ;;  %930 = vmatpush.msra.mxu3 %v738_v59  ;;  %v732_v32 = vld [vmem:[%s1510_s6 + $0x18] sm:$0xff] }
  0xd4   : > { %v482_v39 = vsel %vm479_vm11, %v481_v34, %v477_v24  ;;  %v561_v57 = vor.u32 1.1754944e-38, %v560_v46  ;;  %v901_v1 = vclamps-f32 %v443_v52, 1.0  ;;  %v400_v49 = vmul.f32 0.5, %v1255_v26  ;;  %v731_v46 = vld [vmem:[%s1510_s6 + $0x10] sm:$0xff] }
  0xd5   : > { %v512_v3 = vmul.f32 %v1004_v53, %v511_v0  ;;  %v483_v18 = vmul.f32 %v482_v39, %v458_v42  ;;  %vm559_vm0 = vcmp.eq.f32.partialorder %v558_v51, 8.507059e+37  ;;  %v399_v38 = vmul.f32 0.5, %v1244_v16 }
  0xd6   : > { %v608_v31 = vmul.f32 %v1422_v30, %v1422_v30 }
  0xd7   : > { %v513_v8 = vadd.f32 %v1004_v53, %v512_v3  ;;  %v902_v62 = vclamps-f32 %v483_v18, 1.0 }
  0xd8   : > { %v1006_v27 = vpop.eup %1005  ;;  %v592_v16 = vpop.permute.xlu0 %591 }
  0xd9   : > { %v517_v22 = vsel %vm1344_vm8, %v1004_v53, %v513_v8  ;;  %v550_v2 = vmul.f32 %v1006_v27, %v1323_v60  ;;  %vm555_vm13 = vweird.f32 %v1006_v27  ;;  %v737_v60 = vld [vmem:[%s1510_s6 + $0x40] sm:$0xff]  ;;  %v567_v5 = vadd.f32 1.0, %v902_v62 }
  0xda   : > { %v522_v33 = vsel %vm519_vm9, %v521_v9, %v517_v22  ;;  %vm556_vm15 = vmor %vm554_vm14, %vm555_vm13  ;;  %756 = vmatpush.msra.mxu2 %v737_v60  ;;  %931 = vmatpush.msra.mxu3 %v737_v60  ;;  %v566_v8 = vadd.f32 1.0, %v901_v1 }
  0xdb   : > { %v523_v43 = vmul.f32 %v522_v33, %v498_v36  ;;  %v551_v29 = vsub.f32 1.0, %v550_v2  ;;  %v571_v26 = vmul.f32 %v567_v5, %v399_v38  ;;  %v582_v9 = vpop.permute.xlu1 %581  ;;  %v609_v33 = vmin.f32 %v608_v31, 16.0 }
  0xdc   : > { %757 = vmatpush.msra.mxu2 %v736_v4  ;;  %932 = vmatpush.msra.mxu3 %v736_v4  ;;  %v570_v19 = vmul.f32 %v566_v8, %v398_v15  ;;  %v603_v36 = vunpack.c.h.bf16 %v1417_v10 }
  0xdd   : > { %v552_v50 = vmul.f32 %v1006_v27, %v551_v29  ;;  %v903_v53 = vclamps-f32 %v523_v43, 1.0  ;;  %v595_v22 = vmul.f32 %v582_v9, %v571_v26  ;;  %v621_v34 = vmul.f32 3.8918573e-05, %v609_v33  ;;  %v734_v43 = vld [vmem:[%s1510_s6 + $0x28] sm:$0xff]  ;;  %v733_v29 = vld [vmem:[%s1510_s6 + $0x20] sm:$0xff] }
  0xde   : > { %758 = vmatpush.msra.mxu2 %v735_v6  ;;  %933 = vmatpush.msra.mxu3 %v735_v6  ;;  %v594_v41 = vmul.f32 %v577_v55, %v570_v19  ;;  %v1429_v58 = vmul.f32 0.70710677, %v603_v36  ;;  %v610_v11 = vmul.f32 2.1237322e-06, %v609_v33  ;;  %v730_v26 = vld [vmem:[%s1510_s6 + $0x8] sm:$0xff] }
  0xdf   : > { %v553_v54 = vadd.f32 %v1006_v27, %v552_v50  ;;  %v568_v3 = vadd.f32 1.0, %v903_v53  ;;  %v622_v35 = vadd.f32 0.001143296, %v621_v34 }
  0xe0   : > { %v600_v25 = vpack.c.bf16 %v595_v22, %v594_v41  ;;  %v648_v37 = vmul.f32 %v1429_v58, %v1429_v58  ;;  %759 = vmatpush.msra.mxu2 %v734_v43  ;;  %934 = vmatpush.msra.mxu3 %v734_v43 }
  0xe1   : > { %v557_v63 = vsel %vm556_vm15, %v1006_v27, %v553_v54  ;;  %v572_v12 = vmul.f32 %v568_v3, %v400_v49  ;;  %v922_v27 = vld [vmem:[%s1507_s3] sm:$0xff]  ;;  %v623_v2 = vmul.f32 %v622_v35, %v609_v33  ;;  %v611_v54 = vadd.f32 0.00028619796, %v610_v11 }
  0xe2   : > { %v562_v0 = vsel %vm559_vm0, %v561_v57, %v557_v63  ;;  %v1433_v39 = vmin.f32 %v648_v37, 16.0  ;;  %760 = vmatpush.msra.mxu2 %v733_v29  ;;  %935 = vmatpush.msra.mxu3 %v733_v29 }
  0xe3   : > { %v563_v14 = vmul.f32 %v562_v0, %v538_v61  ;;  %v596_v20 = vmul.f32 %v587_v56, %v572_v12  ;;  %v624_v40 = vadd.f32 0.014752088, %v623_v2  ;;  %v612_v57 = vmul.f32 %v611_v54, %v609_v33 }
  0xe4   : > { %v661_v42 = vmul.f32 3.8918573e-05, %v1433_v39  ;;  %761 = vmatpush.msra.mxu2 %v732_v32  ;;  %936 = vmatpush.msra.mxu3 %v732_v32  ;;  %v650_v61 = vmul.f32 2.1237322e-06, %v1433_v39 }
  0xe5   : > { %v904_v23 = vclamps-f32 %v563_v14, 1.0  ;;  %v625_v44 = vmul.f32 %v624_v40, %v609_v33  ;;  %v613_v63 = vadd.f32 0.0036580483, %v612_v57 }
  0xe6   : > { %v662_v45 = vadd.f32 0.001143296, %v661_v42  ;;  %762 = vmatpush.msra.mxu2 %v731_v46  ;;  %937 = vmatpush.msra.mxu3 %v731_v46  ;;  %v651_v0 = vadd.f32 0.00028619796, %v650_v61  ;;  %v998_v61 = vld [vmem:[%s1511_s7] ss:$0 sm:$0xff] }
  0xe7   : > { %v569_v13 = vadd.f32 1.0, %v904_v23  ;;  %v626_v48 = vadd.f32 0.112945676, %v625_v44  ;;  %v614_v1 = vmul.f32 %v613_v63, %v609_v33 }
  0xe8   : > { %v663_v47 = vmul.f32 %v662_v45, %v1433_v39  ;;  %v652_v3 = vmul.f32 %v651_v0, %v1433_v39  ;;  %763 = vmatpush.msra.mxu2 %v730_v26  ;;  %938 = vmatpush.msra.mxu3 %v730_v26 }
  0xe9   : > { %v573_v17 = vmul.f32 %v569_v13, %v401_v7  ;;  %v627_v50 = vmul.f32 %v626_v48, %v609_v33  ;;  %v615_v49 = vadd.f32 0.05243302, %v614_v1 }
  0xea   : > { %v664_v18 = vadd.f32 0.014752088, %v663_v47  ;;  %v653_v23 = vadd.f32 0.0036580483, %v652_v3 }
  0xeb   : > { %v597_v21 = vmul.f32 %v592_v16, %v573_v17  ;;  %v628_v52 = vadd.f32 0.4994258, %v627_v50  ;;  %v616_v38 = vmul.f32 %v615_v49, %v609_v33  ;;  %v729_v16 = vld [vmem:[%s1510_s6] sm:$0xff] }
  0xec   : > { %v665_v51 = vmul.f32 %v664_v18, %v1433_v39  ;;  %v654_v7 = vmul.f32 %v653_v23, %v1433_v39  ;;  %764 = vmatpush.msra.mxu2 %v729_v16  ;;  %939 = vmatpush.msra.mxu3 %v729_v16 }
  0xed   : > { %v601_v24 = vpack.c.bf16 %v597_v21, %v596_v20  ;;  %v629_v55 = vmul.f32 %v628_v52, %v609_v33  ;;  %v617_v8 = vadd.f32 0.18741608, %v616_v38  ;;  %v605_v52 = vmul.f32 0.5, %v603_v36 }
  0xee   : > { %v666_v53 = vadd.f32 0.112945676, %v665_v51  ;;  %v655_v15 = vadd.f32 0.05243302, %v654_v7 }
  0xef   : > { %721 = vmatpush.bf16.msra.mxu1 %v601_v24  ;;  %v630_v59 = vadd.f32 1.0, %v629_v55  ;;  %v618_v17 = vmul.f32 %v617_v8, %v609_v33 }
  0xf0   : > { %v667_v56 = vmul.f32 %v666_v53, %v1433_v39  ;;  %v656_v22 = vmul.f32 %v655_v15, %v1433_v39 }
  0xf1   : > { %1007 = vrcp.f32 %v630_v59  ;;  %vm636_vm2 = vweird.f32 %v630_v59  ;;  %v642_v19 = vand.u32 2147483648, %v630_v59  ;;  %v640_v21 = vand.u32 2147483647, %v630_v59 }
  0xf2   : > { %v668_v62 = vadd.f32 0.4994258, %v667_v56  ;;  %v619_v24 = vadd.f32 1.1283791, %v618_v17  ;;  %v657_v31 = vadd.f32 0.18741608, %v656_v22 }
  0xf3   : > { %722 = vmatpush.bf16.msra.mxu1 %v600_v25  ;;  %v643_v25 = vor.u32 1.1754944e-38, %v642_v19  ;;  %vm641_vm5 = vcmp.eq.f32.partialorder %v640_v21, 8.507059e+37 }
  0xf4   : > { %v669_v60 = vmul.f32 %v668_v62, %v1433_v39  ;;  %v620_v33 = vmul.f32 %v619_v24, %v1422_v30  ;;  %v658_v2 = vmul.f32 %v657_v31, %v1433_v39  ;;  %v604_v30 = vmul.f32 0.5, %v602_v28 }
  0xf6   : > { %911 = vmatmul.msk.bf16.vlgmr.msra.gmra.mxu1 %vm711_vm1, %v922_v27  ;;  %v670_v4 = vadd.f32 1.0, %v669_v60  ;;  %v659_v29 = vadd.f32 1.1283791, %v658_v2 }
  0xf7   : > { %v1008_v14 = vpop.eup %1007 }
  0xf8   : > { %v632_v5 = vmul.f32 %v1008_v14, %v630_v59  ;;  %1009 = vrcp.f32 %v670_v4  ;;  %vm637_vm3 = vweird.f32 %v1008_v14  ;;  %vm676_vm6 = vweird.f32 %v670_v4 }
  0xf9   : > { %vm638_vm4 = vmor %vm636_vm2, %vm637_vm3  ;;  %v682_v37 = vand.u32 2147483648, %v670_v4  ;;  %v680_v43 = vand.u32 2147483647, %v670_v4  ;;  %v660_v46 = vmul.f32 %v659_v29, %v1429_v58 }
  0xfa   : > { %v633_v6 = vsub.f32 1.0, %v632_v5 }
  0xfb   : > { %v683_v44 = vor.u32 1.1754944e-38, %v682_v37  ;;  %vm681_vm9 = vcmp.eq.f32.partialorder %v680_v43, 8.507059e+37 }
  0xfc   : > { %v634_v13 = vmul.f32 %v1008_v14, %v633_v6 }
  0xfe   : > { %v1010_v12 = vpop.eup %1009  ;;  %v635_v20 = vadd.f32 %v1008_v14, %v634_v13 }
  0xff   : > { %v672_v9 = vmul.f32 %v1010_v12, %v670_v4  ;;  %vm677_vm7 = vweird.f32 %v1010_v12 }
 0x100   : > { %v639_v27 = vsel %vm638_vm4, %v1008_v14, %v635_v20  ;;  %vm678_vm8 = vmor %vm676_vm6, %vm677_vm7 }
 0x101   : > { %v673_v41 = vsub.f32 1.0, %v672_v9  ;;  %v644_v35 = vsel %vm641_vm5, %v643_v25, %v639_v27 }
 0x102   : > { %v645_v40 = vmul.f32 %v644_v35, %v620_v33 }
 0x103   : > { %v674_v34 = vmul.f32 %v1010_v12, %v673_v41 }
 0x104   : > { %v905_v32 = vclamps-f32 %v645_v40, 1.0 }
 0x105   : > { %v675_v42 = vadd.f32 %v1010_v12, %v674_v34 }
 0x106   : > { %v688_v48 = vadd.f32 1.0, %v905_v32 }
 0x107   : > { %v679_v45 = vsel %vm678_vm8, %v1010_v12, %v675_v42 }
 0x108   : > { %v684_v47 = vsel %vm681_vm9, %v683_v44, %v679_v45  ;;  %v690_v18 = vmul.f32 %v688_v48, %v604_v30 }
 0x109   : > { %v685_v39 = vmul.f32 %v684_v47, %v660_v46 }
 0x10b   : > { %v906_v51 = vclamps-f32 %v685_v39, 1.0 }
 0x10d   : > { %v689_v53 = vadd.f32 1.0, %v906_v51 }
 0x10f   : > { %v691_v56 = vmul.f32 %v689_v53, %v605_v52 }
 0x114   : > { %v697_v50 = vpop.permute.xlu2 %696 }
 0x115   : > { %v704_v11 = vmul.f32 %v697_v50, %v690_v18 }
 0x126   : > { %v702_v58 = vpop.permute.xlu2 %701 }
 0x127   : > { %v705_v57 = vmul.f32 %v702_v58, %v691_v56 }
 0x173   : > { %v724_v54 = vpop.f32.mrf.mxu1 }
 0x174   : > { %v725_v55 = vadd.f32 %v724_v54, %v704_v11 }
 0x176   : > { %765 = vmatmul.f32.vlgmr.msra.gmra.mxu2 %v725_v55 }
 0x17b   : > { %v726_v59 = vpop.f32.mrf.mxu1 }
 0x17c   : > { %v727_v28 = vadd.f32 %v726_v59, %v705_v57 }
 0x17e   : > { %768 = vmatmul.f32.vlgmr.msra.gmra.mxu3 %v727_v28 }
 0x1f9   : > { %v766_v62 = vpop.f32.mrf.mxu2 }
 0x1fa   : > { %v767_v10 = vadd.f32 %v998_v61, %v766_v62 }
 0x1fc   : > { %772 = vst [vmem:[%s330_s17] sm:$0xff] %v767_v10 }
 0x201   : > { %v769_v36 = vpop.f32.mrf.mxu3 }
 0x202   : > { %v770_v63 = vadd.f32 %v998_v61, %v769_v36 }
 0x204   : > { %773 = vst [vmem:[%s330_s17 + $0x8] sm:$0xff] %v770_v63 }
 0x205   : > { %1068 = shalt.err (!%p1065_p8)
}
 0x206   : > { %s1113_s25 = smov 128   ;;  %s1114_s17 = smov 8  }
 0x207   : > { %944 = dma.vmem_to_hbm [thread:$0]  (%p1198_p5), %s788_s21, 256, %s790_s22, %s775_s23, %s1113_s25, %s1113_s25, %s1114_s17  }
 0x208 PF: > { %p956_p9 = scmp.ge.s32.totalorder %s1107_s30, 2  ;;  %s804_s19 = sand.u32 1, %s1095_s27  }
 0x209   : > { %s805_s20 = scalar_lea.sflag [#allocation4], %s804_s19 }
 0x20a   : > { %p951_p10 = pnand %p956_p9, %p1202_p6 }
 0x20c   : > { %p952_p11 = pneg %p951_p10 }
 0x20e   : > { %1090 = dma.done.wait (%p952_p11), %s805_s20, 256  }
 0x20f   : > { %1092 = vsyncadd (%p952_p11), %s805_s20, 4294967040  ;;  %p19_p12 = scmp.ge.s32.totalorder %s1185_s11, 6   ;;  %s1521_s27 = smov %s1099_s28 }
 0x210   : > { %s1522_s28 = smov %s1103_s29  ;;  %s1523_s29 = smov %s1196_s14 }
 0x211   : > { %s1524_s30 = smov %s1185_s11  ;;  %21 = sbr.rel (!%p19_p12) target bundleno = 4 (0x4), region = 95 }
 0x216   :  { %811 = vsyncpa [#allocation3], 1 }
 0x217   :  { %813 = vsyncpa [#allocation3 + $0x1], 1 }
 0x218   :  { %814 = vsyncpa [#allocation4], 1 }
 0x219   :  { %816 = vsyncpa [#allocation4 + $0x1], 1 }

</bundles_post_ra>
